<compile_context>
chip_gen: v6e
topology: v6e:2x2x1
jax: 0.10.0
libtpu: 0.0.40
codegen_flags: <defaults>
</compile_context>

<pallas_src>
import functools
import math

import jax
import jax.numpy as jnp
from jax.experimental import pallas as pl
from jax.experimental.pallas import tpu as pltpu


# Rows of the packed [L, 9, E] per-layer vector-parameter slab.
_BQ, _BK, _BV, _BO, _G1, _BE1, _BF2, _G2, _BE2 = range(9)
_VEC_NAMES = ("bq", "bk", "bv", "bo", "g1", "be1", "bf2", "g2", "be2")


def _layernorm(x, gamma, beta, eps=1e-5):
    # single pass: var = E[x^2] - E[x]^2  (two independent lane reductions)
    mean = jnp.mean(x, axis=-1, keepdims=True)
    mean_sq = jnp.mean(x * x, axis=-1, keepdims=True)
    var = jnp.maximum(mean_sq - mean * mean, 0.0)
    return (x - mean) * jax.lax.rsqrt(var + eps) * gamma + beta


def transformer_stack_kernel(
    x_ref, mask_ref,
    wq_ref, wk_ref, wv_ref, wo_ref, vec_ref, w1_ref, bf1_ref, w2_ref,
    out_ref, ctx_ref,
    *, heads,
):
    layer = pl.program_id(1)
    B, S, E = x_ref.shape
    D = E // heads
    BS = B * S
    scale = 1.0 / math.sqrt(float(E))   # spec: softmax(energy / sqrt(embed_size))

    # Layer 0 seeds the VMEM-resident activation from the HBM input; for later
    # layers out_ref still holds the previous layer's output (same output block
    # index across the layer grid axis).
    @pl.when(layer == 0)
    def _():
        out_ref[...] = x_ref[...]

    x = out_ref[...].astype(jnp.float32).reshape(BS, E)      # [BS, E] f32
    xb = x.astype(jnp.bfloat16)

    vecs = vec_ref[0]                                        # [9, E] f32, one DMA
    bq = vecs[_BQ:_BQ + 1, :]
    bk = vecs[_BK:_BK + 1, :]
    bv = vecs[_BV:_BV + 1, :]
    bo = vecs[_BO:_BO + 1, :]
    g1 = vecs[_G1:_G1 + 1, :]
    be1 = vecs[_BE1:_BE1 + 1, :]
    bf2 = vecs[_BF2:_BF2 + 1, :]
    g2 = vecs[_G2:_G2 + 1, :]
    be2 = vecs[_BE2:_BE2 + 1, :]

    # --- QKV projections: [BS,E] x [E,E] bf16 MXU matmuls, f32 accumulation ---
    # Scale folded into q; q/k/v cast to bf16 right away (they are only ever
    # consumed as MXU operands).
    q = ((jnp.dot(xb, wq_ref[0], preferred_element_type=jnp.float32) + bq) * scale
         ).astype(jnp.bfloat16)
    k = (jnp.dot(xb, wk_ref[0], preferred_element_type=jnp.float32) + bk
         ).astype(jnp.bfloat16)
    v = (jnp.dot(xb, wv_ref[0], preferred_element_type=jnp.float32) + bv
         ).astype(jnp.bfloat16)

    # additive mask, hoisted out of the head loop (1 keep -> 0, 0 pad -> -1e20)
    addmask = jnp.where(mask_ref[...] == 0.0,
                        jnp.float32(-1e20), jnp.float32(0.0))        # [B, 1, S]

    # --- multi-head attention, batched over the batch tile -----------------
    # Heads are static column blocks of q/k/v. Each head's context is written
    # into a bf16 [BS, E] scratch at its lane offset so the output projection
    # is a single full-K matmul (no per-head K=head_dim MXU underfill).
    for h in range(heads):                                   # static unroll, small H
        lo = h * D
        qs = q[:, lo:lo + D].reshape(B, S, D)
        ks = k[:, lo:lo + D].reshape(B, S, D)
        vs = v[:, lo:lo + D].reshape(B, S, D)
        energy = jnp.einsum("bqd,bkd->bqk", qs, ks,
                            preferred_element_type=jnp.float32) + addmask
        m = jnp.max(energy, axis=-1, keepdims=True)
        e = jnp.exp(energy - m)
        attn = e * pl.reciprocal(jnp.sum(e, axis=-1, keepdims=True), approx=True)
        ctx = jnp.einsum("bqk,bkd->bqd", attn.astype(jnp.bfloat16), vs,
                         preferred_element_type=jnp.float32)         # [B, S, D]
        ctx_ref[:, lo:lo + D] = ctx.reshape(BS, D).astype(jnp.bfloat16)

    attn_out = jnp.dot(ctx_ref[...], wo_ref[0],
                       preferred_element_type=jnp.float32) + bo      # [BS, E]

    # --- residual + LayerNorm 1 ---
    h1 = _layernorm(x + attn_out, g1, be1)

    # --- feed-forward ---
    f = jnp.dot(h1.astype(jnp.bfloat16), w1_ref[0],
                preferred_element_type=jnp.float32) + bf1_ref[0]
    f = jnp.maximum(f, 0.0)
    f = jnp.dot(f.astype(jnp.bfloat16), w2_ref[0],
                preferred_element_type=jnp.float32) + bf2

    # --- residual + LayerNorm 2 ---
    h2 = _layernorm(f + h1, g2, be2)
    out_ref[...] = h2.reshape(B, S, E).astype(out_ref.dtype)


def _vmem_limit_bytes(default=48 * 1024 * 1024):
    """Generation-aware scoped-VMEM limit (3/4 of physical), safe fallback."""
    try:
        cap = getattr(pltpu.get_tpu_info(), "vmem_capacity_bytes", None)
        if cap:
            return int(cap) * 3 // 4
    except Exception:
        pass
    return default


def _pick_batch_tile(N, S, E, hidden, vmem_budget):
    """Smallest divisor of N that makes BS = tile*S >= 256 (fills the 256-deep
    MXU on v6e/v7x; >=128 already fills v5e) while fitting the VMEM budget;
    otherwise the largest divisor that fits."""
    best = 1
    for tile in range(1, N + 1):
        if N % tile:
            continue
        bs = tile * S
        act = bs * E * 4 * 8 + bs * hidden * 4 * 2          # ~8 live f32 [BS,E] slabs + FFN hidden
        wts = 2 * 2 * (4 * E * E + 2 * E * hidden)          # double-buffered bf16 layer weights
        if act + wts <= vmem_budget:
            best = tile
            if bs >= 256:
                break
    return best


def encoder_stack(x, mask3, stacked, *, heads, batch_tile=None):
    N, S, E = x.shape
    L = stacked["wq"].shape[0]
    hidden = stacked["w1"].shape[-1]
    assert E % heads == 0

    vmem_budget = _vmem_limit_bytes()
    if batch_tile is None:
        batch_tile = _pick_batch_tile(N, S, E, hidden, vmem_budget)
    assert N % batch_tile == 0

    kernel = functools.partial(transformer_stack_kernel, heads=heads)

    def layer_spec(a):
        return pl.BlockSpec((1,) + a.shape[1:], lambda b, l: (l, 0, 0))

    return pl.pallas_call(
        kernel,
        out_shape=jax.ShapeDtypeStruct((N, S, E), jnp.float32),
        grid_spec=pltpu.PrefetchScalarGridSpec(
            num_scalar_prefetch=0,
            # layer axis innermost: required by the VMEM-resident output trick
            grid=(N // batch_tile, L),
            in_specs=[pl.BlockSpec((batch_tile, S, E), lambda b, l: (b, 0, 0)),
                      pl.BlockSpec((batch_tile, 1, S), lambda b, l: (b, 0, 0)),
                      layer_spec(stacked["wq"]), layer_spec(stacked["wk"]),
                      layer_spec(stacked["wv"]), layer_spec(stacked["wo"]),
                      layer_spec(stacked["vecs"]), layer_spec(stacked["w1"]),
                      layer_spec(stacked["bf1"]), layer_spec(stacked["w2"])],
            out_specs=pl.BlockSpec((batch_tile, S, E), lambda b, l: (b, 0, 0)),
            scratch_shapes=[pltpu.VMEM((batch_tile * S, E), jnp.bfloat16)],
        ),
        compiler_params=pltpu.CompilerParams(
            dimension_semantics=("parallel", "arbitrary"),
            vmem_limit_bytes=int(vmem_budget)),
    )(x, mask3, stacked["wq"], stacked["wk"], stacked["wv"], stacked["wo"],
      stacked["vecs"], stacked["w1"], stacked["bf1"], stacked["w2"])


# ---------------- parameter construction (deterministic) ----------------
def _init_linear(key, fan_in, fan_out):
    k1, k2 = jax.random.split(key)
    bound = 1.0 / math.sqrt(fan_in)
    w = jax.random.uniform(k1, (fan_in, fan_out), jnp.float32, -bound, bound)
    b = jax.random.uniform(k2, (fan_out,), jnp.float32, -bound, bound)
    return w, b


def init_encoder_params(key, *, vocab, max_len, embed_size, num_layers,
                        forward_expansion):
    keys = jax.random.split(key, 2 + num_layers)
    word_emb = 0.02 * jax.random.normal(keys[0], (vocab, embed_size), jnp.float32)
    pos_emb = 0.02 * jax.random.normal(keys[1], (max_len, embed_size), jnp.float32)

    hidden = forward_expansion * embed_size
    layers = []
    for li in range(num_layers):
        lk = jax.random.split(keys[2 + li], 6)
        wq, bq = _init_linear(lk[0], embed_size, embed_size)
        wk, bk = _init_linear(lk[1], embed_size, embed_size)
        wv, bv = _init_linear(lk[2], embed_size, embed_size)
        wo, bo = _init_linear(lk[3], embed_size, embed_size)
        w1, bf1 = _init_linear(lk[4], embed_size, hidden)
        w2, bf2 = _init_linear(lk[5], hidden, embed_size)
        layers.append(dict(
            wq=wq, bq=bq, wk=wk, bk=bk, wv=wv, bv=bv, wo=wo, bo=bo,
            g1=jnp.ones((embed_size,), jnp.float32),
            be1=jnp.zeros((embed_size,), jnp.float32),
            w1=w1, bf1=bf1, w2=w2, bf2=bf2,
            g2=jnp.ones((embed_size,), jnp.float32),
            be2=jnp.zeros((embed_size,), jnp.float32),
        ))
    return word_emb, pos_emb, layers


def stack_params(layers):
    """Stack per-layer params along a leading layer axis for the fused kernel.
    Matmul weights -> bf16 (MXU operand dtype); the nine [E]-sized vector
    params are packed into one [L, 9, E] f32 slab (single DMA per layer)."""
    stacked = {}
    for name in ("wq", "wk", "wv", "wo", "w1", "w2"):
        stacked[name] = jnp.stack([l[name] for l in layers]).astype(jnp.bfloat16)
    stacked["bf1"] = jnp.stack([l["bf1"][None, :] for l in layers])       # [L,1,hidden] f32
    stacked["vecs"] = jnp.stack(
        [jnp.stack([l[n] for n in _VEC_NAMES]) for l in layers])          # [L,9,E]   f32
    return stacked


# ---------------- pure-JAX f32 reference (matches the PyTorch spec) ----------------
def reference_forward(x, mask3, layers, *, heads):
    N, S, E = x.shape
    D = E // heads
    scale = 1.0 / math.sqrt(float(E))
    out = x
    for l in layers:
        q = out @ l["wq"] + l["bq"]
        k = out @ l["wk"] + l["bk"]
        v = out @ l["wv"] + l["bv"]
        qh = q.reshape(N, S, heads, D)
        kh = k.reshape(N, S, heads, D)
        vh = v.reshape(N, S, heads, D)
        energy = jnp.einsum("nqhd,nkhd->nhqk", qh, kh)
        energy = jnp.where(mask3[:, None, :, :] == 0.0, jnp.float32(-1e20), energy)
        attn = jax.nn.softmax(energy * scale, axis=-1)
        ctx = jnp.einsum("nhqk,nkhd->nqhd", attn, vh).reshape(N, S, E)
        attn_out = ctx @ l["wo"] + l["bo"]
        h1 = _layernorm(out + attn_out, l["g1"], l["be1"])
        f = jnp.maximum(h1 @ l["w1"] + l["bf1"], 0.0) @ l["w2"] + l["bf2"]
        out = _layernorm(f + h1, l["g2"], l["be2"])
    return out


def encoder_forward(tokens, mask, word_emb, pos_emb, stacked, *, heads,
                    batch_tile=None):
    N, S = tokens.shape
    # glue: embedding gathers + add stay in plain JAX (not the hot path)
    positions = jnp.arange(S, dtype=jnp.int32)
    x = word_emb[tokens] + pos_emb[positions][None, :, :]          # [N, S, E] f32
    mask3 = mask.reshape(N, 1, S).astype(jnp.float32)
    return encoder_stack(x, mask3, stacked, heads=heads, batch_tile=batch_tile)


if __name__ == "__main__":
    # small config consistent with the module; E chosen as a multiple of 128
    # so activations/outputs are lane-dense.
    VOCAB, MAX_LEN = 50, 16
    EMBED, HEADS, LAYERS, FF_EXP = 128, 4, 2, 4
    N, S = 2, 8

    key = jax.random.PRNGKey(0)
    k_tok, k_params = jax.random.split(key)
    tokens = jax.random.randint(k_tok, (N, S), 0, VOCAB, dtype=jnp.int32)
    # padding mask: second example has last two tokens padded
    mask = jnp.array([[1, 1, 1, 1, 1, 1, 1, 1],
                      [1, 1, 1, 1, 1, 1, 0, 0]], dtype=jnp.float32)

    word_emb, pos_emb, layers = init_encoder_params(
        k_params, vocab=VOCAB, max_len=MAX_LEN, embed_size=EMBED,
        num_layers=LAYERS, forward_expansion=FF_EXP)
    stacked = stack_params(layers)

    positions = jnp.arange(S, dtype=jnp.int32)
    x = word_emb[tokens] + pos_emb[positions][None, :, :]          # [N, S, E] f32
    mask3 = mask.reshape(N, 1, S).astype(jnp.float32)

    out = encoder_stack(x, mask3, stacked, heads=HEADS)
    out = jax.block_until_ready(out)

    assert out.shape == (N, S, EMBED)
    assert bool(jnp.all(jnp.isfinite(out)))

    # numerical check vs a pure-JAX f32 reference (bf16 MXU + approx reciprocal
    # in the kernel -> loose tolerance)
    ref = reference_forward(x, mask3, layers, heads=HEADS)
    err = float(jnp.max(jnp.abs(out - ref)))
    assert err < 0.15, f"max abs err vs f32 reference: {err}"

    print("KERNEL_OK")
</pallas_src>

<mosaic_0001>
module attributes {stable_mosaic.version = 11 : i64} {
  func.func @transformer_stack_kernel(%arg0: i32, %arg1: i32, %arg2: memref<2x8x128xf32, #tpu.memory_space<vmem>>, %arg3: memref<2x1x8xf32, #tpu.memory_space<vmem>>, %arg4: memref<1x128x128xbf16, #tpu.memory_space<vmem>>, %arg5: memref<1x128x128xbf16, #tpu.memory_space<vmem>>, %arg6: memref<1x128x128xbf16, #tpu.memory_space<vmem>>, %arg7: memref<1x128x128xbf16, #tpu.memory_space<vmem>>, %arg8: memref<1x9x128xf32, #tpu.memory_space<vmem>>, %arg9: memref<1x128x512xbf16, #tpu.memory_space<vmem>>, %arg10: memref<1x1x512xf32, #tpu.memory_space<vmem>>, %arg11: memref<1x512x128xbf16, #tpu.memory_space<vmem>>, %arg12: memref<2x8x128xf32, #tpu.memory_space<vmem>>, %arg13: memref<16x128xbf16, #tpu.memory_space<vmem>>) attributes {dimension_semantics = [#tpu.dimension_semantics<parallel>, #tpu.dimension_semantics<arbitrary>], iteration_bounds = array<i64: 1, 2>, scalar_prefetch = 0 : i64, scratch_operands = 1 : i64, tpu.core_type = #tpu.core_type<tc>, window_params = [{transform_indices = @transform_0, window_bounds = array<i64: 2, 8, 128>}, {transform_indices = @transform_1, window_bounds = array<i64: 2, 1, 8>}, {transform_indices = @transform_2, window_bounds = array<i64: 1, 128, 128>}, {transform_indices = @transform_3, window_bounds = array<i64: 1, 128, 128>}, {transform_indices = @transform_4, window_bounds = array<i64: 1, 128, 128>}, {transform_indices = @transform_5, window_bounds = array<i64: 1, 128, 128>}, {transform_indices = @transform_6, window_bounds = array<i64: 1, 9, 128>}, {transform_indices = @transform_7, window_bounds = array<i64: 1, 128, 512>}, {transform_indices = @transform_8, window_bounds = array<i64: 1, 1, 512>}, {transform_indices = @transform_9, window_bounds = array<i64: 1, 512, 128>}, {transform_indices = @transform_10, window_bounds = array<i64: 2, 8, 128>}]} {
    %c0_i32 = arith.constant 0 : i32
    %0 = arith.cmpi eq, %arg1, %c0_i32 : i32
    %1 = arith.extui %0 : i1 to i32
    %c0_i32_0 = arith.constant 0 : i32
    %2 = arith.cmpi ne, %1, %c0_i32_0 : i32
    scf.if %2 {
      %c0_78 = arith.constant 0 : index
      %c0_79 = arith.constant 0 : index
      %c0_80 = arith.constant 0 : index
      %213 = vector.load %arg2[%c0_78, %c0_79, %c0_80] : memref<2x8x128xf32, #tpu.memory_space<vmem>>, vector<2x8x128xf32>
      %c0_81 = arith.constant 0 : index
      %c0_82 = arith.constant 0 : index
      %c0_83 = arith.constant 0 : index
      %214 = vector.load %arg12[%c0_81, %c0_82, %c0_83] : memref<2x8x128xf32, #tpu.memory_space<vmem>>, vector<2x8x128xf32>
      tpu.vector_store %arg12[%c0_81, %c0_82, %c0_83], %213 {strides = array<i32>} : memref<2x8x128xf32, #tpu.memory_space<vmem>>, vector<2x8x128xf32>,
    } else {
    }
    %c0 = arith.constant 0 : index
    %c0_1 = arith.constant 0 : index
    %c0_2 = arith.constant 0 : index
    %3 = vector.load %arg12[%c0, %c0_1, %c0_2] : memref<2x8x128xf32, #tpu.memory_space<vmem>>, vector<2x8x128xf32>
    %4 = vector.shape_cast %3 : vector<2x8x128xf32> to vector<16x128xf32>
    %5 = arith.truncf %4 : vector<16x128xf32> to vector<16x128xbf16>
    %c0_3 = arith.constant 0 : index
    %c0_4 = arith.constant 0 : index
    %c0_5 = arith.constant 0 : index
    %6 = vector.load %arg8[%c0_3, %c0_4, %c0_5] : memref<1x9x128xf32, #tpu.memory_space<vmem>>, vector<1x9x128xf32>
    %7 = vector.shape_cast %6 : vector<1x9x128xf32> to vector<9x128xf32>
    %8 = vector.extract_strided_slice %7 {offsets = [0, 0], sizes = [1, 128], strides = [1, 1]} : vector<9x128xf32> to vector<1x128xf32>
    %9 = vector.extract_strided_slice %7 {offsets = [1, 0], sizes = [1, 128], strides = [1, 1]} : vector<9x128xf32> to vector<1x128xf32>
    %10 = vector.extract_strided_slice %7 {offsets = [2, 0], sizes = [1, 128], strides = [1, 1]} : vector<9x128xf32> to vector<1x128xf32>
    %11 = vector.extract_strided_slice %7 {offsets = [3, 0], sizes = [1, 128], strides = [1, 1]} : vector<9x128xf32> to vector<1x128xf32>
    %12 = vector.extract_strided_slice %7 {offsets = [4, 0], sizes = [1, 128], strides = [1, 1]} : vector<9x128xf32> to vector<1x128xf32>
    %13 = vector.extract_strided_slice %7 {offsets = [5, 0], sizes = [1, 128], strides = [1, 1]} : vector<9x128xf32> to vector<1x128xf32>
    %14 = vector.extract_strided_slice %7 {offsets = [6, 0], sizes = [1, 128], strides = [1, 1]} : vector<9x128xf32> to vector<1x128xf32>
    %15 = vector.extract_strided_slice %7 {offsets = [7, 0], sizes = [1, 128], strides = [1, 1]} : vector<9x128xf32> to vector<1x128xf32>
    %16 = vector.extract_strided_slice %7 {offsets = [8, 0], sizes = [1, 128], strides = [1, 1]} : vector<9x128xf32> to vector<1x128xf32>
    %c0_6 = arith.constant 0 : index
    %c0_7 = arith.constant 0 : index
    %c0_8 = arith.constant 0 : index
    %17 = vector.load %arg4[%c0_6, %c0_7, %c0_8] : memref<1x128x128xbf16, #tpu.memory_space<vmem>>, vector<1x128x128xbf16>
    %18 = vector.shape_cast %17 : vector<1x128x128xbf16> to vector<128x128xbf16>
    %cst = arith.constant dense<0.000000e+00> : vector<16x128xf32>
    %19 = tpu.matmul %5, %18, %cst {dimension_numbers = #tpu.dot_dimension_numbers<[1], [0], [0], [1], [0, 0, 1, 1], [], []>} : vector<16x128xbf16>, vector<128x128xbf16>, vector<16x128xf32> -> vector<16x128xf32>
    %20 = vector.broadcast %8 : vector<1x128xf32> to vector<16x128xf32>
    %21 = arith.addf %19, %20 : vector<16x128xf32>
    %cst_9 = arith.constant 0.0883883461 : f32
    %22 = vector.broadcast %cst_9 : f32 to vector<16x128xf32>
    %23 = arith.mulf %21, %22 : vector<16x128xf32>
    %24 = arith.truncf %23 : vector<16x128xf32> to vector<16x128xbf16>
    %c0_10 = arith.constant 0 : index
    %c0_11 = arith.constant 0 : index
    %c0_12 = arith.constant 0 : index
    %25 = vector.load %arg5[%c0_10, %c0_11, %c0_12] : memref<1x128x128xbf16, #tpu.memory_space<vmem>>, vector<1x128x128xbf16>
    %26 = vector.shape_cast %25 : vector<1x128x128xbf16> to vector<128x128xbf16>
    %cst_13 = arith.constant dense<0.000000e+00> : vector<16x128xf32>
    %27 = tpu.matmul %5, %26, %cst_13 {dimension_numbers = #tpu.dot_dimension_numbers<[1], [0], [0], [1], [0, 0, 1, 1], [], []>} : vector<16x128xbf16>, vector<128x128xbf16>, vector<16x128xf32> -> vector<16x128xf32>
    %28 = vector.broadcast %9 : vector<1x128xf32> to vector<16x128xf32>
    %29 = arith.addf %27, %28 : vector<16x128xf32>
    %30 = arith.truncf %29 : vector<16x128xf32> to vector<16x128xbf16>
    %c0_14 = arith.constant 0 : index
    %c0_15 = arith.constant 0 : index
    %c0_16 = arith.constant 0 : index
    %31 = vector.load %arg6[%c0_14, %c0_15, %c0_16] : memref<1x128x128xbf16, #tpu.memory_space<vmem>>, vector<1x128x128xbf16>
    %32 = vector.shape_cast %31 : vector<1x128x128xbf16> to vector<128x128xbf16>
    %cst_17 = arith.constant dense<0.000000e+00> : vector<16x128xf32>
    %33 = tpu.matmul %5, %32, %cst_17 {dimension_numbers = #tpu.dot_dimension_numbers<[1], [0], [0], [1], [0, 0, 1, 1], [], []>} : vector<16x128xbf16>, vector<128x128xbf16>, vector<16x128xf32> -> vector<16x128xf32>
    %34 = vector.broadcast %10 : vector<1x128xf32> to vector<16x128xf32>
    %35 = arith.addf %33, %34 : vector<16x128xf32>
    %36 = arith.truncf %35 : vector<16x128xf32> to vector<16x128xbf16>
    %c0_18 = arith.constant 0 : index
    %c0_19 = arith.constant 0 : index
    %c0_20 = arith.constant 0 : index
    %37 = vector.load %arg3[%c0_18, %c0_19, %c0_20] : memref<2x1x8xf32, #tpu.memory_space<vmem>>, vector<2x1x8xf32>
    %cst_21 = arith.constant 0.000000e+00 : f32
    %38 = vector.broadcast %cst_21 : f32 to vector<2x1x8xf32>
    %39 = arith.cmpf oeq, %37, %38 : vector<2x1x8xf32>
    %cst_22 = arith.constant -1.000000e+20 : f32
    %cst_23 = arith.constant 0.000000e+00 : f32
    %40 = vector.broadcast %cst_22 : f32 to vector<2x1x8xf32>
    %41 = vector.broadcast %cst_23 : f32 to vector<2x1x8xf32>
    %42 = arith.select %39, %40, %41 : vector<2x1x8xi1>, vector<2x1x8xf32>
    %43 = vector.extract_strided_slice %24 {offsets = [0, 0], sizes = [16, 32], strides = [1, 1]} : vector<16x128xbf16> to vector<16x32xbf16>
    %44 = vector.shape_cast %43 : vector<16x32xbf16> to vector<2x8x32xbf16>
    %45 = vector.extract_strided_slice %30 {offsets = [0, 0], sizes = [16, 32], strides = [1, 1]} : vector<16x128xbf16> to vector<16x32xbf16>
    %46 = vector.shape_cast %45 : vector<16x32xbf16> to vector<2x8x32xbf16>
    %47 = vector.extract_strided_slice %36 {offsets = [0, 0], sizes = [16, 32], strides = [1, 1]} : vector<16x128xbf16> to vector<16x32xbf16>
    %48 = vector.shape_cast %47 : vector<16x32xbf16> to vector<2x8x32xbf16>
    "tpu.trace_start"() <{level = 10 : i32, message = "bqd,bkd->bqk"}> : () -> ()
    %cst_24 = arith.constant dense<0.000000e+00> : vector<2x8x8xf32>
    %49 = tpu.matmul %44, %46, %cst_24 {dimension_numbers = #tpu.dot_dimension_numbers<[2], [2], [1], [1], [0, 0, 0, 1, 1, 1], [0], [0]>} : vector<2x8x32xbf16>, vector<2x8x32xbf16>, vector<2x8x8xf32> -> vector<2x8x8xf32>
    "tpu.trace_stop"() : () -> ()
    %50 = vector.broadcast %42 : vector<2x1x8xf32> to vector<2x8x8xf32>
    %51 = arith.addf %49, %50 : vector<2x8x8xf32>
    %cst_25 = arith.constant dense<0xFF800000> : vector<2x8xf32>
    %52 = vector.multi_reduction <maximumf>, %51, %cst_25 [2] : vector<2x8x8xf32> to vector<2x8xf32>
    %53 = vector.shape_cast %52 : vector<2x8xf32> to vector<2x8x1xf32>
    %54 = vector.broadcast %53 : vector<2x8x1xf32> to vector<2x8x8xf32>
    %55 = arith.subf %51, %54 : vector<2x8x8xf32>
    %56 = math.exp %55 : vector<2x8x8xf32>
    %cst_26 = arith.constant dense<0.000000e+00> : vector<2x8xf32>
    %57 = vector.multi_reduction <add>, %56, %cst_26 [2] : vector<2x8x8xf32> to vector<2x8xf32>
    %58 = vector.shape_cast %57 : vector<2x8xf32> to vector<2x8x1xf32>
    %59 = tpu.reciprocal %58 {approx = true} : vector<2x8x1xf32> -> vector<2x8x1xf32>
    %60 = vector.broadcast %59 : vector<2x8x1xf32> to vector<2x8x8xf32>
    %61 = arith.mulf %56, %60 : vector<2x8x8xf32>
    %62 = arith.truncf %61 : vector<2x8x8xf32> to vector<2x8x8xbf16>
    "tpu.trace_start"() <{level = 10 : i32, message = "bqk,bkd->bqd"}> : () -> ()
    %cst_27 = arith.constant dense<0.000000e+00> : vector<2x8x32xf32>
    %63 = tpu.matmul %62, %48, %cst_27 {dimension_numbers = #tpu.dot_dimension_numbers<[2], [1], [1], [2], [0, 0, 0, 1, 1, 2], [0], [0]>} : vector<2x8x8xbf16>, vector<2x8x32xbf16>, vector<2x8x32xf32> -> vector<2x8x32xf32>
    "tpu.trace_stop"() : () -> ()
    %64 = vector.shape_cast %63 : vector<2x8x32xf32> to vector<16x32xf32>
    %65 = arith.truncf %64 : vector<16x32xf32> to vector<16x32xbf16>
    %c0_28 = arith.constant 0 : index
    %c0_29 = arith.constant 0 : index
    %66 = vector.load %arg13[%c0_28, %c0_29] : memref<16x128xbf16, #tpu.memory_space<vmem>>, vector<16x32xbf16>
    tpu.vector_store %arg13[%c0_28, %c0_29], %65 {strides = array<i32>} : memref<16x128xbf16, #tpu.memory_space<vmem>>, vector<16x32xbf16>,
    %67 = vector.extract_strided_slice %24 {offsets = [0, 32], sizes = [16, 32], strides = [1, 1]} : vector<16x128xbf16> to vector<16x32xbf16>
    %68 = vector.shape_cast %67 : vector<16x32xbf16> to vector<2x8x32xbf16>
    %69 = vector.extract_strided_slice %30 {offsets = [0, 32], sizes = [16, 32], strides = [1, 1]} : vector<16x128xbf16> to vector<16x32xbf16>
    %70 = vector.shape_cast %69 : vector<16x32xbf16> to vector<2x8x32xbf16>
    %71 = vector.extract_strided_slice %36 {offsets = [0, 32], sizes = [16, 32], strides = [1, 1]} : vector<16x128xbf16> to vector<16x32xbf16>
    %72 = vector.shape_cast %71 : vector<16x32xbf16> to vector<2x8x32xbf16>
    "tpu.trace_start"() <{level = 10 : i32, message = "bqd,bkd->bqk"}> : () -> ()
    %cst_30 = arith.constant dense<0.000000e+00> : vector<2x8x8xf32>
    %73 = tpu.matmul %68, %70, %cst_30 {dimension_numbers = #tpu.dot_dimension_numbers<[2], [2], [1], [1], [0, 0, 0, 1, 1, 1], [0], [0]>} : vector<2x8x32xbf16>, vector<2x8x32xbf16>, vector<2x8x8xf32> -> vector<2x8x8xf32>
    "tpu.trace_stop"() : () -> ()
    %74 = vector.broadcast %42 : vector<2x1x8xf32> to vector<2x8x8xf32>
    %75 = arith.addf %73, %74 : vector<2x8x8xf32>
    %cst_31 = arith.constant dense<0xFF800000> : vector<2x8xf32>
    %76 = vector.multi_reduction <maximumf>, %75, %cst_31 [2] : vector<2x8x8xf32> to vector<2x8xf32>
    %77 = vector.shape_cast %76 : vector<2x8xf32> to vector<2x8x1xf32>
    %78 = vector.broadcast %77 : vector<2x8x1xf32> to vector<2x8x8xf32>
    %79 = arith.subf %75, %78 : vector<2x8x8xf32>
    %80 = math.exp %79 : vector<2x8x8xf32>
    %cst_32 = arith.constant dense<0.000000e+00> : vector<2x8xf32>
    %81 = vector.multi_reduction <add>, %80, %cst_32 [2] : vector<2x8x8xf32> to vector<2x8xf32>
    %82 = vector.shape_cast %81 : vector<2x8xf32> to vector<2x8x1xf32>
    %83 = tpu.reciprocal %82 {approx = true} : vector<2x8x1xf32> -> vector<2x8x1xf32>
    %84 = vector.broadcast %83 : vector<2x8x1xf32> to vector<2x8x8xf32>
    %85 = arith.mulf %80, %84 : vector<2x8x8xf32>
    %86 = arith.truncf %85 : vector<2x8x8xf32> to vector<2x8x8xbf16>
    "tpu.trace_start"() <{level = 10 : i32, message = "bqk,bkd->bqd"}> : () -> ()
    %cst_33 = arith.constant dense<0.000000e+00> : vector<2x8x32xf32>
    %87 = tpu.matmul %86, %72, %cst_33 {dimension_numbers = #tpu.dot_dimension_numbers<[2], [1], [1], [2], [0, 0, 0, 1, 1, 2], [0], [0]>} : vector<2x8x8xbf16>, vector<2x8x32xbf16>, vector<2x8x32xf32> -> vector<2x8x32xf32>
    "tpu.trace_stop"() : () -> ()
    %88 = vector.shape_cast %87 : vector<2x8x32xf32> to vector<16x32xf32>
    %89 = arith.truncf %88 : vector<16x32xf32> to vector<16x32xbf16>
    %c0_34 = arith.constant 0 : index
    %c32 = arith.constant 32 : index
    %90 = vector.load %arg13[%c0_34, %c32] : memref<16x128xbf16, #tpu.memory_space<vmem>>, vector<16x32xbf16>
    tpu.vector_store %arg13[%c0_34, %c32], %89 {strides = array<i32>} : memref<16x128xbf16, #tpu.memory_space<vmem>>, vector<16x32xbf16>,
    %91 = vector.extract_strided_slice %24 {offsets = [0, 64], sizes = [16, 32], strides = [1, 1]} : vector<16x128xbf16> to vector<16x32xbf16>
    %92 = vector.shape_cast %91 : vector<16x32xbf16> to vector<2x8x32xbf16>
    %93 = vector.extract_strided_slice %30 {offsets = [0, 64], sizes = [16, 32], strides = [1, 1]} : vector<16x128xbf16> to vector<16x32xbf16>
    %94 = vector.shape_cast %93 : vector<16x32xbf16> to vector<2x8x32xbf16>
    %95 = vector.extract_strided_slice %36 {offsets = [0, 64], sizes = [16, 32], strides = [1, 1]} : vector<16x128xbf16> to vector<16x32xbf16>
    %96 = vector.shape_cast %95 : vector<16x32xbf16> to vector<2x8x32xbf16>
    "tpu.trace_start"() <{level = 10 : i32, message = "bqd,bkd->bqk"}> : () -> ()
    %cst_35 = arith.constant dense<0.000000e+00> : vector<2x8x8xf32>
    %97 = tpu.matmul %92, %94, %cst_35 {dimension_numbers = #tpu.dot_dimension_numbers<[2], [2], [1], [1], [0, 0, 0, 1, 1, 1], [0], [0]>} : vector<2x8x32xbf16>, vector<2x8x32xbf16>, vector<2x8x8xf32> -> vector<2x8x8xf32>
    "tpu.trace_stop"() : () -> ()
    %98 = vector.broadcast %42 : vector<2x1x8xf32> to vector<2x8x8xf32>
    %99 = arith.addf %97, %98 : vector<2x8x8xf32>
    %cst_36 = arith.constant dense<0xFF800000> : vector<2x8xf32>
    %100 = vector.multi_reduction <maximumf>, %99, %cst_36 [2] : vector<2x8x8xf32> to vector<2x8xf32>
    %101 = vector.shape_cast %100 : vector<2x8xf32> to vector<2x8x1xf32>
    %102 = vector.broadcast %101 : vector<2x8x1xf32> to vector<2x8x8xf32>
    %103 = arith.subf %99, %102 : vector<2x8x8xf32>
    %104 = math.exp %103 : vector<2x8x8xf32>
    %cst_37 = arith.constant dense<0.000000e+00> : vector<2x8xf32>
    %105 = vector.multi_reduction <add>, %104, %cst_37 [2] : vector<2x8x8xf32> to vector<2x8xf32>
    %106 = vector.shape_cast %105 : vector<2x8xf32> to vector<2x8x1xf32>
    %107 = tpu.reciprocal %106 {approx = true} : vector<2x8x1xf32> -> vector<2x8x1xf32>
    %108 = vector.broadcast %107 : vector<2x8x1xf32> to vector<2x8x8xf32>
    %109 = arith.mulf %104, %108 : vector<2x8x8xf32>
    %110 = arith.truncf %109 : vector<2x8x8xf32> to vector<2x8x8xbf16>
    "tpu.trace_start"() <{level = 10 : i32, message = "bqk,bkd->bqd"}> : () -> ()
    %cst_38 = arith.constant dense<0.000000e+00> : vector<2x8x32xf32>
    %111 = tpu.matmul %110, %96, %cst_38 {dimension_numbers = #tpu.dot_dimension_numbers<[2], [1], [1], [2], [0, 0, 0, 1, 1, 2], [0], [0]>} : vector<2x8x8xbf16>, vector<2x8x32xbf16>, vector<2x8x32xf32> -> vector<2x8x32xf32>
    "tpu.trace_stop"() : () -> ()
    %112 = vector.shape_cast %111 : vector<2x8x32xf32> to vector<16x32xf32>
    %113 = arith.truncf %112 : vector<16x32xf32> to vector<16x32xbf16>
    %c0_39 = arith.constant 0 : index
    %c64 = arith.constant 64 : index
    %114 = vector.load %arg13[%c0_39, %c64] : memref<16x128xbf16, #tpu.memory_space<vmem>>, vector<16x32xbf16>
    tpu.vector_store %arg13[%c0_39, %c64], %113 {strides = array<i32>} : memref<16x128xbf16, #tpu.memory_space<vmem>>, vector<16x32xbf16>,
    %115 = vector.extract_strided_slice %24 {offsets = [0, 96], sizes = [16, 32], strides = [1, 1]} : vector<16x128xbf16> to vector<16x32xbf16>
    %116 = vector.shape_cast %115 : vector<16x32xbf16> to vector<2x8x32xbf16>
    %117 = vector.extract_strided_slice %30 {offsets = [0, 96], sizes = [16, 32], strides = [1, 1]} : vector<16x128xbf16> to vector<16x32xbf16>
    %118 = vector.shape_cast %117 : vector<16x32xbf16> to vector<2x8x32xbf16>
    %119 = vector.extract_strided_slice %36 {offsets = [0, 96], sizes = [16, 32], strides = [1, 1]} : vector<16x128xbf16> to vector<16x32xbf16>
    %120 = vector.shape_cast %119 : vector<16x32xbf16> to vector<2x8x32xbf16>
    "tpu.trace_start"() <{level = 10 : i32, message = "bqd,bkd->bqk"}> : () -> ()
    %cst_40 = arith.constant dense<0.000000e+00> : vector<2x8x8xf32>
    %121 = tpu.matmul %116, %118, %cst_40 {dimension_numbers = #tpu.dot_dimension_numbers<[2], [2], [1], [1], [0, 0, 0, 1, 1, 1], [0], [0]>} : vector<2x8x32xbf16>, vector<2x8x32xbf16>, vector<2x8x8xf32> -> vector<2x8x8xf32>
    "tpu.trace_stop"() : () -> ()
    %122 = vector.broadcast %42 : vector<2x1x8xf32> to vector<2x8x8xf32>
    %123 = arith.addf %121, %122 : vector<2x8x8xf32>
    %cst_41 = arith.constant dense<0xFF800000> : vector<2x8xf32>
    %124 = vector.multi_reduction <maximumf>, %123, %cst_41 [2] : vector<2x8x8xf32> to vector<2x8xf32>
    %125 = vector.shape_cast %124 : vector<2x8xf32> to vector<2x8x1xf32>
    %126 = vector.broadcast %125 : vector<2x8x1xf32> to vector<2x8x8xf32>
    %127 = arith.subf %123, %126 : vector<2x8x8xf32>
    %128 = math.exp %127 : vector<2x8x8xf32>
    %cst_42 = arith.constant dense<0.000000e+00> : vector<2x8xf32>
    %129 = vector.multi_reduction <add>, %128, %cst_42 [2] : vector<2x8x8xf32> to vector<2x8xf32>
    %130 = vector.shape_cast %129 : vector<2x8xf32> to vector<2x8x1xf32>
    %131 = tpu.reciprocal %130 {approx = true} : vector<2x8x1xf32> -> vector<2x8x1xf32>
    %132 = vector.broadcast %131 : vector<2x8x1xf32> to vector<2x8x8xf32>
    %133 = arith.mulf %128, %132 : vector<2x8x8xf32>
    %134 = arith.truncf %133 : vector<2x8x8xf32> to vector<2x8x8xbf16>
    "tpu.trace_start"() <{level = 10 : i32, message = "bqk,bkd->bqd"}> : () -> ()
    %cst_43 = arith.constant dense<0.000000e+00> : vector<2x8x32xf32>
    %135 = tpu.matmul %134, %120, %cst_43 {dimension_numbers = #tpu.dot_dimension_numbers<[2], [1], [1], [2], [0, 0, 0, 1, 1, 2], [0], [0]>} : vector<2x8x8xbf16>, vector<2x8x32xbf16>, vector<2x8x32xf32> -> vector<2x8x32xf32>
    "tpu.trace_stop"() : () -> ()
    %136 = vector.shape_cast %135 : vector<2x8x32xf32> to vector<16x32xf32>
    %137 = arith.truncf %136 : vector<16x32xf32> to vector<16x32xbf16>
    %c0_44 = arith.constant 0 : index
    %c96 = arith.constant 96 : index
    %138 = vector.load %arg13[%c0_44, %c96] : memref<16x128xbf16, #tpu.memory_space<vmem>>, vector<16x32xbf16>
    tpu.vector_store %arg13[%c0_44, %c96], %137 {strides = array<i32>} : memref<16x128xbf16, #tpu.memory_space<vmem>>, vector<16x32xbf16>,
    %c0_45 = arith.constant 0 : index
    %c0_46 = arith.constant 0 : index
    %139 = vector.load %arg13[%c0_45, %c0_46] : memref<16x128xbf16, #tpu.memory_space<vmem>>, vector<16x128xbf16>
    %c0_47 = arith.constant 0 : index
    %c0_48 = arith.constant 0 : index
    %c0_49 = arith.constant 0 : index
    %140 = vector.load %arg7[%c0_47, %c0_48, %c0_49] : memref<1x128x128xbf16, #tpu.memory_space<vmem>>, vector<1x128x128xbf16>
    %141 = vector.shape_cast %140 : vector<1x128x128xbf16> to vector<128x128xbf16>
    %cst_50 = arith.constant dense<0.000000e+00> : vector<16x128xf32>
    %142 = tpu.matmul %139, %141, %cst_50 {dimension_numbers = #tpu.dot_dimension_numbers<[1], [0], [0], [1], [0, 0, 1, 1], [], []>} : vector<16x128xbf16>, vector<128x128xbf16>, vector<16x128xf32> -> vector<16x128xf32>
    %143 = vector.broadcast %11 : vector<1x128xf32> to vector<16x128xf32>
    %144 = arith.addf %142, %143 : vector<16x128xf32>
    %145 = arith.addf %4, %144 : vector<16x128xf32>
    %cst_51 = arith.constant dense<0.000000e+00> : vector<16xf32>
    %146 = vector.multi_reduction <add>, %145, %cst_51 [1] : vector<16x128xf32> to vector<16xf32>
    %147 = vector.shape_cast %146 : vector<16xf32> to vector<16x1xf32>
    %cst_52 = arith.constant 1.280000e+02 : f32
    %148 = vector.broadcast %cst_52 : f32 to vector<16x1xf32>
    %149 = arith.divf %147, %148 : vector<16x1xf32>
    %150 = arith.mulf %145, %145 : vector<16x128xf32>
    %cst_53 = arith.constant dense<0.000000e+00> : vector<16xf32>
    %151 = vector.multi_reduction <add>, %150, %cst_53 [1] : vector<16x128xf32> to vector<16xf32>
    %152 = vector.shape_cast %151 : vector<16xf32> to vector<16x1xf32>
    %cst_54 = arith.constant 1.280000e+02 : f32
    %153 = vector.broadcast %cst_54 : f32 to vector<16x1xf32>
    %154 = arith.divf %152, %153 : vector<16x1xf32>
    %155 = arith.mulf %149, %149 : vector<16x1xf32>
    %156 = arith.subf %154, %155 : vector<16x1xf32>
    %cst_55 = arith.constant 0.000000e+00 : f32
    %157 = vector.broadcast %cst_55 : f32 to vector<16x1xf32>
    %158 = arith.maximumf %156, %157 : vector<16x1xf32>
    %159 = vector.broadcast %149 : vector<16x1xf32> to vector<16x128xf32>
    %160 = arith.subf %145, %159 : vector<16x128xf32>
    %cst_56 = arith.constant 9.99999974E-6 : f32
    %161 = vector.broadcast %cst_56 : f32 to vector<16x1xf32>
    %162 = arith.addf %158, %161 : vector<16x1xf32>
    %163 = math.rsqrt %162 : vector<16x1xf32>
    %164 = vector.broadcast %163 : vector<16x1xf32> to vector<16x128xf32>
    %165 = arith.mulf %160, %164 : vector<16x128xf32>
    %166 = vector.broadcast %12 : vector<1x128xf32> to vector<16x128xf32>
    %167 = arith.mulf %165, %166 : vector<16x128xf32>
    %168 = vector.broadcast %13 : vector<1x128xf32> to vector<16x128xf32>
    %169 = arith.addf %167, %168 : vector<16x128xf32>
    %170 = arith.truncf %169 : vector<16x128xf32> to vector<16x128xbf16>
    %c0_57 = arith.constant 0 : index
    %c0_58 = arith.constant 0 : index
    %c0_59 = arith.constant 0 : index
    %171 = vector.load %arg9[%c0_57, %c0_58, %c0_59] : memref<1x128x512xbf16, #tpu.memory_space<vmem>>, vector<1x128x512xbf16>
    %172 = vector.shape_cast %171 : vector<1x128x512xbf16> to vector<128x512xbf16>
    %cst_60 = arith.constant dense<0.000000e+00> : vector<16x512xf32>
    %173 = tpu.matmul %170, %172, %cst_60 {dimension_numbers = #tpu.dot_dimension_numbers<[1], [0], [0], [1], [0, 0, 1, 1], [], []>} : vector<16x128xbf16>, vector<128x512xbf16>, vector<16x512xf32> -> vector<16x512xf32>
    %c0_61 = arith.constant 0 : index
    %c0_62 = arith.constant 0 : index
    %c0_63 = arith.constant 0 : index
    %174 = vector.load %arg10[%c0_61, %c0_62, %c0_63] : memref<1x1x512xf32, #tpu.memory_space<vmem>>, vector<1x1x512xf32>
    %175 = vector.shape_cast %174 : vector<1x1x512xf32> to vector<1x512xf32>
    %176 = vector.broadcast %175 : vector<1x512xf32> to vector<16x512xf32>
    %177 = arith.addf %173, %176 : vector<16x512xf32>
    %cst_64 = arith.constant 0.000000e+00 : f32
    %178 = vector.broadcast %cst_64 : f32 to vector<16x512xf32>
    %179 = arith.maximumf %177, %178 : vector<16x512xf32>
    %180 = arith.truncf %179 : vector<16x512xf32> to vector<16x512xbf16>
    %c0_65 = arith.constant 0 : index
    %c0_66 = arith.constant 0 : index
    %c0_67 = arith.constant 0 : index
    %181 = vector.load %arg11[%c0_65, %c0_66, %c0_67] : memref<1x512x128xbf16, #tpu.memory_space<vmem>>, vector<1x512x128xbf16>
    %182 = vector.shape_cast %181 : vector<1x512x128xbf16> to vector<512x128xbf16>
    %cst_68 = arith.constant dense<0.000000e+00> : vector<16x128xf32>
    %183 = tpu.matmul %180, %182, %cst_68 {dimension_numbers = #tpu.dot_dimension_numbers<[1], [0], [0], [1], [0, 0, 1, 1], [], []>} : vector<16x512xbf16>, vector<512x128xbf16>, vector<16x128xf32> -> vector<16x128xf32>
    %184 = vector.broadcast %14 : vector<1x128xf32> to vector<16x128xf32>
    %185 = arith.addf %183, %184 : vector<16x128xf32>
    %186 = arith.addf %185, %169 : vector<16x128xf32>
    %cst_69 = arith.constant dense<0.000000e+00> : vector<16xf32>
    %187 = vector.multi_reduction <add>, %186, %cst_69 [1] : vector<16x128xf32> to vector<16xf32>
    %188 = vector.shape_cast %187 : vector<16xf32> to vector<16x1xf32>
    %cst_70 = arith.constant 1.280000e+02 : f32
    %189 = vector.broadcast %cst_70 : f32 to vector<16x1xf32>
    %190 = arith.divf %188, %189 : vector<16x1xf32>
    %191 = arith.mulf %186, %186 : vector<16x128xf32>
    %cst_71 = arith.constant dense<0.000000e+00> : vector<16xf32>
    %192 = vector.multi_reduction <add>, %191, %cst_71 [1] : vector<16x128xf32> to vector<16xf32>
    %193 = vector.shape_cast %192 : vector<16xf32> to vector<16x1xf32>
    %cst_72 = arith.constant 1.280000e+02 : f32
    %194 = vector.broadcast %cst_72 : f32 to vector<16x1xf32>
    %195 = arith.divf %193, %194 : vector<16x1xf32>
    %196 = arith.mulf %190, %190 : vector<16x1xf32>
    %197 = arith.subf %195, %196 : vector<16x1xf32>
    %cst_73 = arith.constant 0.000000e+00 : f32
    %198 = vector.broadcast %cst_73 : f32 to vector<16x1xf32>
    %199 = arith.maximumf %197, %198 : vector<16x1xf32>
    %200 = vector.broadcast %190 : vector<16x1xf32> to vector<16x128xf32>
    %201 = arith.subf %186, %200 : vector<16x128xf32>
    %cst_74 = arith.constant 9.99999974E-6 : f32
    %202 = vector.broadcast %cst_74 : f32 to vector<16x1xf32>
    %203 = arith.addf %199, %202 : vector<16x1xf32>
    %204 = math.rsqrt %203 : vector<16x1xf32>
    %205 = vector.broadcast %204 : vector<16x1xf32> to vector<16x128xf32>
    %206 = arith.mulf %201, %205 : vector<16x128xf32>
    %207 = vector.broadcast %15 : vector<1x128xf32> to vector<16x128xf32>
    %208 = arith.mulf %206, %207 : vector<16x128xf32>
    %209 = vector.broadcast %16 : vector<1x128xf32> to vector<16x128xf32>
    %210 = arith.addf %208, %209 : vector<16x128xf32>
    %211 = vector.shape_cast %210 : vector<16x128xf32> to vector<2x8x128xf32>
    %c0_75 = arith.constant 0 : index
    %c0_76 = arith.constant 0 : index
    %c0_77 = arith.constant 0 : index
    %212 = vector.load %arg12[%c0_75, %c0_76, %c0_77] : memref<2x8x128xf32, #tpu.memory_space<vmem>>, vector<2x8x128xf32>
    tpu.vector_store %arg12[%c0_75, %c0_76, %c0_77], %211 {strides = array<i32>} : memref<2x8x128xf32, #tpu.memory_space<vmem>>, vector<2x8x128xf32>,
    return
  }
  func.func @transform_0(%arg0: i32, %arg1: i32) -> (i32, i32, i32) {
    %c0_i32 = arith.constant 0 : i32
    %c0_i32_0 = arith.constant 0 : i32
    %c0_i32_1 = arith.constant 0 : i32
    return %arg0, %c0_i32, %c0_i32_0 : i32, i32, i32
  }
  func.func @transform_1(%arg0: i32, %arg1: i32) -> (i32, i32, i32) {
    %c0_i32 = arith.constant 0 : i32
    %c0_i32_0 = arith.constant 0 : i32
    %c0_i32_1 = arith.constant 0 : i32
    return %arg0, %c0_i32, %c0_i32_0 : i32, i32, i32
  }
  func.func @transform_2(%arg0: i32, %arg1: i32) -> (i32, i32, i32) {
    %c0_i32 = arith.constant 0 : i32
    %c0_i32_0 = arith.constant 0 : i32
    %c0_i32_1 = arith.constant 0 : i32
    return %arg1, %c0_i32, %c0_i32_0 : i32, i32, i32
  }
  func.func @transform_3(%arg0: i32, %arg1: i32) -> (i32, i32, i32) {
    %c0_i32 = arith.constant 0 : i32
    %c0_i32_0 = arith.constant 0 : i32
    %c0_i32_1 = arith.constant 0 : i32
    return %arg1, %c0_i32, %c0_i32_0 : i32, i32, i32
  }
  func.func @transform_4(%arg0: i32, %arg1: i32) -> (i32, i32, i32) {
    %c0_i32 = arith.constant 0 : i32
    %c0_i32_0 = arith.constant 0 : i32
    %c0_i32_1 = arith.constant 0 : i32
    return %arg1, %c0_i32, %c0_i32_0 : i32, i32, i32
  }
  func.func @transform_5(%arg0: i32, %arg1: i32) -> (i32, i32, i32) {
    %c0_i32 = arith.constant 0 : i32
    %c0_i32_0 = arith.constant 0 : i32
    %c0_i32_1 = arith.constant 0 : i32
    return %arg1, %c0_i32, %c0_i32_0 : i32, i32, i32
  }
  func.func @transform_6(%arg0: i32, %arg1: i32) -> (i32, i32, i32) {
    %c0_i32 = arith.constant 0 : i32
    %c0_i32_0 = arith.constant 0 : i32
    %c0_i32_1 = arith.constant 0 : i32
    return %arg1, %c0_i32, %c0_i32_0 : i32, i32, i32
  }
  func.func @transform_7(%arg0: i32, %arg1: i32) -> (i32, i32, i32) {
    %c0_i32 = arith.constant 0 : i32
    %c0_i32_0 = arith.constant 0 : i32
    %c0_i32_1 = arith.constant 0 : i32
    return %arg1, %c0_i32, %c0_i32_0 : i32, i32, i32
  }
  func.func @transform_8(%arg0: i32, %arg1: i32) -> (i32, i32, i32) {
    %c0_i32 = arith.constant 0 : i32
    %c0_i32_0 = arith.constant 0 : i32
    %c0_i32_1 = arith.constant 0 : i32
    return %arg1, %c0_i32, %c0_i32_0 : i32, i32, i32
  }
  func.func @transform_9(%arg0: i32, %arg1: i32) -> (i32, i32, i32) {
    %c0_i32 = arith.constant 0 : i32
    %c0_i32_0 = arith.constant 0 : i32
    %c0_i32_1 = arith.constant 0 : i32
    return %arg1, %c0_i32, %c0_i32_0 : i32, i32, i32
  }
  func.func @transform_10(%arg0: i32, %arg1: i32) -> (i32, i32, i32) {
    %c0_i32 = arith.constant 0 : i32
    %c0_i32_0 = arith.constant 0 : i32
    %c0_i32_1 = arith.constant 0 : i32
    return %arg0, %c0_i32, %c0_i32_0 : i32, i32, i32
  }
}

</mosaic_0001>

<bundles_post_ra>
// kernel: tpu_custom_call.1
= control target key start
LH: loop header
LB: loop body
LE: loop exit
PB: predicated region body
PF: predicated region fallthrough
CT: control target
= control target key end

     0   :  { %s4758_s0 = inlined_call_operand.vmem [shape: f32[2,8,128], index: 0, kind: input, shape index: {}]   ;;  %s4759_s1 = inlined_call_operand.vmem [shape: f32[2,1,8], index: 1, kind: input, shape index: {}]   ;;  %s4760_s2 = inlined_call_operand.hbm [shape: bf16[2,128,128], index: 2, kind: input, shape index: {}]   ;;  %s4761_s3 = inlined_call_operand.hbm [shape: bf16[2,128,128], index: 3, kind: input, shape index: {}]   ;;  %s4762_s4 = inlined_call_operand.hbm [shape: bf16[2,128,128], index: 4, kind: input, shape index: {}]   ;;  %s4763_s5 = inlined_call_operand.hbm [shape: bf16[2,128,128], index: 5, kind: input, shape index: {}]   ;;  %s4764_s6 = inlined_call_operand.vmem [shape: f32[2,9,128], index: 6, kind: input, shape index: {}]   ;;  %s4765_s7 = inlined_call_operand.hbm [shape: bf16[2,128,512], index: 7, kind: input, shape index: {}]   ;;  %s4766_s8 = inlined_call_operand.vmem [shape: f32[2,1,512], index: 8, kind: input, shape index: {}]   ;;  %s4767_s9 = inlined_call_operand.hbm [shape: bf16[2,512,128], index: 9, kind: input, shape index: {}]   ;;  %s4768_s10 = inlined_call_operand.hbm [shape: f32[2,8,128], index: 10, kind: output, shape index: {}]  }
   0x1   :  { %4778 = sst [smem:[#allocation26_spill]] %s4758_s0 }
   0x2   :  { %4779 = sst [smem:[#allocation27_spill]] %s4759_s1 }
   0x3   :  { %4780 = sst [smem:[#allocation28_spill]] %s4761_s3 }
   0x4   :  { %4781 = sst [smem:[#allocation29_spill]] %s4763_s5 }
   0x5   :  { %4782 = sst [smem:[#allocation30_spill]] %s4764_s6 }
   0x6   :  { %4783 = sst [smem:[#allocation31_spill]] %s4766_s8 }
   0x7   :  { %4784 = sst [smem:[#allocation32_spill]] %s4768_s10 }
   0x8   :  { %15 = vsyncpa [#allocation4], 0 }
   0x9   :  { %17 = vsyncpa [#allocation4 + $0x1], 0 }
   0xa   :  { %18 = vsyncpa [#allocation7], 0 }
   0xb   :  { %20 = vsyncpa [#allocation7 + $0x1], 0 }
   0xc   :  { %21 = vsyncpa [#allocation10], 0 }
   0xd   :  { %23 = vsyncpa [#allocation10 + $0x1], 0 }
   0xe   :  { %24 = vsyncpa [#allocation13], 0 }
   0xf   :  { %26 = vsyncpa [#allocation13 + $0x1], 0 }
  0x10   :  { %27 = vsyncpa [#allocation5], 0  ;;  %s4118_s13 = smov 0   ;;  %s4120_s14 = smov 0  }
  0x11   :  { %s4122_s15 = smov 0   ;;  %s4124_s16 = smov 0  }
  0x12   :  { %s4126_s17 = smov 0   ;;  %s4128_s18 = smov 0  }
  0x13 LB: > { %4785 = sst [smem:[#allocation20_spill]] %s4030_s15  ;;  %s4147_s19 = sadd.s32 4294967295, %s4042_s18   ;;  %s4042_s18 = sphi %s4128_s18, %s33_s18   ;;  %s4038_s17 = sphi %s4126_s17, %s4813_s17   ;;  %s4034_s16 = sphi %s4124_s16, %s4812_s16   ;;  %s4030_s15 = sphi %s4122_s15, %s4808_s15   ;;  %s4026_s14 = sphi %s4120_s14, %s4811_s14   ;;  %s4022_s13 = sphi %s4118_s13, %s4810_s13  }
  0x14   : > { %4786 = sst [smem:[#allocation21_spill]] %s4034_s16  ;;  %s42_s20 = sadd.s32 1, %s4038_s17 }
  0x15   : > { %4787 = sst [smem:[#allocation22_spill]] %s4042_s18  ;;  %p43_p0 = scmp.ge.s32.totalorder %s42_s20, 2 }
  0x16   : > { %4788 = sst [smem:[#allocation23_spill]] %s4147_s19  ;;  %s104_s21 = sadd.s32 1, %s4030_s15 }
  0x17   : > { %p111_p1 = scmp.ne.s32.totalorder %s4030_s15, %s4026_s14  ;;  %p112_p2 = scmp.eq.s32.totalorder %s4042_s18, 0 }
  0x18   : > { %s4815_s20 = smov (%p43_p0, %s42_s20), 0  ;;  %p117_p4 = scmp.ne.s32.totalorder %s4026_s14, %s4022_s13 }
  0x19   : > { %4789 = sst [smem:[#allocation24_spill]] %s4815_s20  ;;  %p113_p3 = por %p112_p2, %p111_p1 }
  0x1a   : > { %s101_s22 = ssub.s32 %s4038_s17, %s4815_s20  ;;  %p118_p5 = scmp.eq.s32.totalorder %s4147_s19, 0 }
  0x1b   : > { %p102_p6 = scmp.eq.s32.totalorder %s101_s22, 0  ;;  %p3564_p8 = scmp.lt.s32.totalorder %s4042_s18, 2 }
  0x1c   : > { %p4160_p7 = por %p118_p5, %p117_p4  ;;  %s4169_s25 = sand.u32 1, %s4030_s15  }
  0x1d   : > { %s4166_s24 = scalar_select %p102_p6, %s4030_s15, %s104_s21  }
  0x1e   : > { %s4172_s26 = sshll.u32 %s4038_s17, 10  ;;  %s4175_s27 = sshll.u32 %s4169_s25, 6 }
  0x1f   : > { %4791 = sst [smem:[#allocation25_spill]] %s4166_s24  ;;  %p4177_p9 = pnand %p3564_p8, %p113_p3 }
  0x20   : > { %s4770_s29 = sand.u32 1, %s4042_s18   ;;  %s4793_s3 = sld [smem:[#allocation28_spill]] }
  0x21   : > { %s391_s13 = scalar_lea.vmem [#allocation6], %s4175_s27  ;;  %p3077_p10 = scmp.ge.s32.totalorder %s4042_s18, 1 }
  0x22   : > { %s398_s21 = sshll.u32 %s391_s13, 4  ;;  %s4190_s22 = scalar_lea.sflag [#allocation7], %s4770_s29  ;;  %s399_s21 = int_to_ptr.vmem [resolvable:$true] %s398_s21 }
  0x23   : > { %p4194_p11 = pneg %p4177_p9  ;;  %s3797_s24 = scalar_lea.vmem %s399_s21, 1024 }
  0x24   : > { %p3798_p12 = scmp.ne.s32.totalorder %s399_s21, %s3797_s24  ;;  %s4044_s30 = smov [#allocation6]  }
  0x25   : > { %s3802_s11 = sshll.u32 %s4044_s30, 4  ;;  %s3803_s11 = int_to_ptr.vmem [resolvable:$false] %s3802_s11 }
  0x26   : > { %s397_s12 = scalar_lea.hbm %s4793_s3, %s4172_s26  ;;  %p3800_p13 = pnand %p3798_p12, %p4194_p11 }
  0x27   : > { %s3804_s13 = scalar_lea.vmem %s3803_s11, 2048  ;;  %p3805_p1 = scmp.lt.s32.totalorder %s399_s21, %s3803_s11 }
  0x28   : > { %p3801_p0 = pneg %p3800_p13  ;;  %p3806_p2 = scmp.lt.s32.totalorder %s3804_s13, %s3797_s24 }
  0x2a   : > { %p3807_p3 = por %p3806_p2, %p3805_p1 }
  0x2c   : > { %p3808_p4 = pnand %p3807_p3, %p3801_p0 }
  0x2e   : > { %3811 = shalt.err (!%p3808_p4)
}
  0x2f   : > { %s4045_s29 = smov 64   ;;  %s4046_s3 = smov 4  }
  0x30   : > { %3551 = dma.hbm_to_vmem [thread:$0]  (!%p4177_p9), %s397_s12, 1024, %s399_s21, %s4190_s22, %s4045_s29, %s4045_s29, %s4046_s3  }
  0x31   : > { %p505_p5 = scmp.lt.s32.totalorder %s4042_s18, 3  ;;  %s4795_s5 = sld [smem:[#allocation29_spill]] }
  0x32   : > { %s433_s15 = scalar_lea.vmem [#allocation9], %s4175_s27  ;;  %s4797_s1 = sand.u32 1, %s4042_s18  }
  0x33   : > { %p4213_p6 = pnand %p3077_p10, %p505_p5  ;;  %s440_s10 = sshll.u32 %s433_s15, 4  ;;  %s441_s10 = int_to_ptr.vmem [resolvable:$true] %s440_s10 }
  0x34   : > { %s4220_s0 = scalar_lea.sflag [#allocation10], %s4797_s1  ;;  %s3825_s8 = scalar_lea.vmem %s441_s10, 1024 }
  0x35   : > { %p3826_p8 = scmp.ne.s32.totalorder %s441_s10, %s3825_s8  ;;  %s4047_s12 = smov [#allocation9]  }
  0x36   : > { %s3830_s21 = sshll.u32 %s4047_s12, 4  ;;  %s3831_s21 = int_to_ptr.vmem [resolvable:$false] %s3830_s21 }
  0x37   : > { %s439_s11 = scalar_lea.hbm %s4795_s5, %s4172_s26  ;;  %p3828_p12 = pnand %p3826_p8, %p4194_p11 }
  0x38   : > { %s3832_s24 = scalar_lea.vmem %s3831_s21, 2048  ;;  %p3833_p0 = scmp.lt.s32.totalorder %s441_s10, %s3831_s21 }
  0x39   : > { %p3829_p13 = pneg %p3828_p12  ;;  %p3834_p10 = scmp.lt.s32.totalorder %s3832_s24, %s3825_s8 }
  0x3b   : > { %p3835_p1 = por %p3834_p10, %p3833_p0 }
  0x3d   : > { %p3836_p2 = pnand %p3835_p1, %p3829_p13 }
  0x3f   : > { %3839 = shalt.err (!%p3836_p2)
}
  0x40   : > { %3557 = dma.hbm_to_vmem [thread:$0]  (!%p4177_p9), %s439_s11, 1024, %s441_s10, %s4220_s0, %s4045_s29, %s4045_s29, %s4046_s3  }
  0x41   : > { %s376_s30 = scalar_lea.hbm %s4760_s2, %s4172_s26  ;;  %s370_s8 = scalar_lea.vmem [#allocation3], %s4175_s27 }
  0x42   : > { %s377_s12 = sshll.u32 %s370_s8, 4  ;;  %s418_s5 = scalar_lea.hbm %s4762_s4, %s4172_s26  ;;  %s378_s12 = int_to_ptr.vmem [resolvable:$true] %s377_s12 }
  0x43   : > { %s367_s18 = scalar_lea.sflag [#allocation4], %s4169_s25  ;;  %s3853_s6 = scalar_lea.vmem %s378_s12, 1024 }
  0x44   : > { %p3854_p3 = scmp.ne.s32.totalorder %s378_s12, %s3853_s6  ;;  %s4048_s16 = smov [#allocation3]  }
  0x45   : > { %s3858_s19 = sshll.u32 %s4048_s16, 4  ;;  %s3859_s19 = int_to_ptr.vmem [resolvable:$false] %s3858_s19 }
  0x46   : > { %p3856_p4 = pnand %p3854_p3, %p4194_p11  ;;  %s3860_s10 = scalar_lea.vmem %s3859_s19, 2048 }
  0x47   : > { %p3861_p8 = scmp.lt.s32.totalorder %s378_s12, %s3859_s19  ;;  %p3862_p12 = scmp.lt.s32.totalorder %s3860_s10, %s3853_s6 }
  0x48   : > { %p3857_p5 = pneg %p3856_p4 }
  0x49   : > { %p3863_p13 = por %p3862_p12, %p3861_p8 }
  0x4b   : > { %p3864_p0 = pnand %p3863_p13, %p3857_p5 }
  0x4d   : > { %3867 = shalt.err (!%p3864_p0)
}
  0x4e   : > { %3548 = dma.hbm_to_vmem [thread:$0]  (!%p4177_p9), %s376_s30, 1024, %s378_s12, %s367_s18, %s4045_s29, %s4045_s29, %s4046_s3  }
  0x4f   : > { %s412_s11 = scalar_lea.vmem [#allocation8], %s4175_s27  ;;  %s3071_s15 = sshll.u32 %s4169_s25, 8 }
  0x50   : > { %s419_s1 = sshll.u32 %s412_s11, 4  ;;  %s4049_s6 = smov [#allocation8]   ;;  %s420_s1 = int_to_ptr.vmem [resolvable:$true] %s419_s1 }
  0x51   : > { %s3881_s16 = scalar_lea.vmem %s420_s1, 1024  ;;  %s3886_s19 = sshll.u32 %s4049_s6, 4  ;;  %s3887_s19 = int_to_ptr.vmem [resolvable:$false] %s3886_s19 }
  0x52   : > { %p3882_p10 = scmp.ne.s32.totalorder %s420_s1, %s3881_s16  ;;  %s3888_s8 = scalar_lea.vmem %s3887_s19, 2048 }
  0x53   : > { %p3889_p3 = scmp.lt.s32.totalorder %s420_s1, %s3887_s19  ;;  %p3890_p4 = scmp.lt.s32.totalorder %s3888_s8, %s3881_s16 }
  0x54   : > { %p3884_p1 = pnand %p3882_p10, %p4194_p11 }
  0x55   : > { %p3891_p5 = por %p3890_p4, %p3889_p3 }
  0x56   : > { %p3885_p2 = pneg %p3884_p1 }
  0x58   : > { %p3892_p8 = pnand %p3891_p5, %p3885_p2 }
  0x5a   : > { %3895 = shalt.err (!%p3892_p8)
}
  0x5b   : > { %3554 = dma.hbm_to_vmem [thread:$0]  (!%p4177_p9), %s418_s5, 1024, %s420_s1, %s4190_s22, %s4045_s29, %s4045_s29, %s4046_s3  }
  0x5c   : > { %s3224_s30 = sshll.u32 %s4038_s17, 12  ;;  %s462_s12 = scalar_lea.vmem [#allocation11], %s3071_s15 }
  0x5d   : > { %s469_s21 = sshll.u32 %s462_s12, 4  ;;  %s468_s11 = scalar_lea.hbm %s4765_s7, %s3224_s30  ;;  %s470_s21 = int_to_ptr.vmem [resolvable:$true] %s469_s21 }
  0x5e   : > { %s3909_s16 = scalar_lea.vmem %s470_s21, 4096  ;;  %s4050_s6 = smov [#allocation11]  }
  0x5f   : > { %p3910_p12 = scmp.ne.s32.totalorder %s470_s21, %s3909_s16  ;;  %s3914_s26 = sshll.u32 %s4050_s6, 4  ;;  %s3915_s26 = int_to_ptr.vmem [resolvable:$false] %s3914_s26 }
  0x60   : > { %s3916_s19 = scalar_lea.vmem %s3915_s26, 8192  ;;  %p3917_p10 = scmp.lt.s32.totalorder %s470_s21, %s3915_s26 }
  0x61   : > { %p3912_p13 = pnand %p3910_p12, %p4194_p11  ;;  %p3918_p1 = scmp.lt.s32.totalorder %s3916_s19, %s3909_s16 }
  0x63   : > { %p3913_p0 = pneg %p3912_p13  ;;  %p3919_p2 = por %p3918_p1, %p3917_p10 }
  0x65   : > { %p3920_p3 = pnand %p3919_p2, %p3913_p0 }
  0x67   : > { %3923 = shalt.err (!%p3920_p3)
}
  0x68   : > { %s4051_s5 = smov 256   ;;  %s4052_s22 = smov 16  }
  0x69   : > { %3560 = dma.hbm_to_vmem [thread:$0]  (!%p4177_p9), %s468_s11, 4096, %s470_s21, %s4220_s0, %s4051_s5, %s4051_s5, %s4052_s22  }
  0x6a   : > { %s496_s18 = scalar_lea.hbm %s4767_s9, %s3224_s30  ;;  %s490_s27 = scalar_lea.vmem [#allocation12], %s3071_s15 }
  0x6b   : > { %s497_s12 = sshll.u32 %s490_s27, 4  ;;  %s487_s24 = scalar_lea.sflag [#allocation13], %s4169_s25  ;;  %s498_s12 = int_to_ptr.vmem [resolvable:$true] %s497_s12 }
  0x6c   : > { %s3937_s10 = scalar_lea.vmem %s498_s12, 4096  ;;  %s4053_s16 = smov [#allocation12]  }
  0x6d   : > { %p3938_p4 = scmp.ne.s32.totalorder %s498_s12, %s3937_s10  ;;  %s3942_s6 = sshll.u32 %s4053_s16, 4  ;;  %s3943_s6 = int_to_ptr.vmem [resolvable:$false] %s3942_s6 }
  0x6e   : > { %s3944_s26 = scalar_lea.vmem %s3943_s6, 8192  ;;  %p3945_p12 = scmp.lt.s32.totalorder %s498_s12, %s3943_s6 }
  0x6f   : > { %p3940_p5 = pnand %p3938_p4, %p4194_p11  ;;  %p3946_p13 = scmp.lt.s32.totalorder %s3944_s26, %s3937_s10 }
  0x71   : > { %p3941_p8 = pneg %p3940_p5  ;;  %p3947_p0 = por %p3946_p13, %p3945_p12 }
  0x73   : > { %p3948_p10 = pnand %p3947_p0, %p3941_p8 }
  0x75   : > { %3951 = shalt.err (!%p3948_p10)
}
  0x76   : > { %3563 = dma.hbm_to_vmem [thread:$0]  (!%p4177_p9), %s496_s18, 4096, %s498_s12, %s487_s24, %s4045_s29, %s4045_s29, %s4046_s3  }
  0x77   : > { %509 = sbr.rel (%p4213_p6) target bundleno = 3757 (0xead), region = 60  ;;  %s511_s0 = sand.u32 (!%p4213_p6), 1, %s4026_s14  }
  0x78   : > { %s3078_s20 = sshll.u32 (!%p4213_p6), %s511_s0, 6  ;;  %s512_s25 = scalar_lea.sflag (!%p4213_p6), [#allocation4], %s511_s0 }
  0x79   : > { %s4289_s15 = scalar_lea.vmem (!%p4213_p6), [#allocation3], %s3078_s20 }
  0x7c   : > { %4001 = dma.done.wait (%p4160_p7), %s512_s25, 1024  }
  0x7d   : > { %4003 = vsyncadd (%p4160_p7), %s512_s25, 4294966272  ;;  %s4798_s28 = sld [smem:[#allocation23_spill]]  ;;  %s4296_s3 = scalar_lea.vmem [#allocation6], %s3078_s20 }
  0x83   : > { %s520_s30 = sand.u32 1, %s4798_s28  }
  0x84   : > { %s521_s21 = scalar_lea.sflag [#allocation7], %s520_s30 }
  0x85   : > { %4005 = dma.done.wait (%p4160_p7), %s521_s21, 2048  }
  0x86   : > { %4007 = vsyncadd (%p4160_p7), %s521_s21, 4294965248  ;;  %s4302_s29 = scalar_lea.vmem [#allocation8], %s3078_s20  ;;  %s539_s13 = scalar_lea.sflag [#allocation10], %s520_s30 }
  0x87   : > { %s4304_s11 = scalar_lea.vmem [#allocation9], %s3078_s20 }
  0x88   : > { %4009 = dma.done.wait (%p4160_p7), %s539_s13, 5120  }
  0x89   : > { %4011 = vsyncadd (%p4160_p7), %s539_s13, 4294962176  ;;  %s3082_s19 = sshll.u32 %s511_s0, 8  ;;  %s557_s22 = scalar_lea.sflag [#allocation13], %s511_s0 }
  0x8a   : > { %s4310_s5 = scalar_lea.vmem [#allocation11], %s3082_s19  ;;  %s4312_s1 = scalar_lea.vmem [#allocation12], %s3082_s19 }
  0x8b   : > { %4013 = dma.done.wait (%p4160_p7), %s557_s22, 4096  }
  0x8c   : > { %4015 = vsyncadd (%p4160_p7), %s557_s22, 4294963200  ;;  %s4799_s8 = sld [smem:[#allocation21_spill]] }
  0x8d   : > { %s4800_s16 = sld [smem:[#allocation30_spill]] }
  0x8e   : > { %s4801_s20 = sld [smem:[#allocation31_spill]] }
  0x92   : > { %p646_p9 = scmp.lt.s32.totalorder %s4799_s8, 1  ;;  %p3087_p11 = scmp.ne.s32.totalorder %s4799_s8, 0 }
  0x93   : > { %s4802_s30 = sld [smem:[#allocation26_spill]] (!%p3087_p11) }
  0x94   : > { %s647_s18 = scalar_select %p646_p9, %s4799_s8, 1 }
  0x95   : > { %660 = sbr.rel (%p3087_p11) target bundleno = 156 (0x9c), region = 88 }
  0x96   : > { %s3226_s27 = sshll.u32 %s647_s18, 4  ;;  %s3086_s12 = sshll.u32 %s647_s18, 2 }
  0x97   : > { %s4323_s6 = scalar_lea.vmem %s4800_s16, %s3226_s27  ;;  %s4328_s25 = scalar_lea.vmem %s4801_s20, %s3086_s12 }
  0x9a   : > { %v661_v0 = vld [vmem:[%s4802_s30] sm:$0xff]  ;;  %v662_v1 = vld [vmem:[%s4802_s30 + $0x8] sm:$0xff] }
  0x9b   : > { %663 = vst [vmem:[#allocation14] sm:$0xff] %v661_v0  ;;  %664 = vst [vmem:[#allocation14 + $0x8] sm:$0xff] %v662_v1 }
  0x9c PF: > { %v3628_v2 = vld [vmem:[%s4289_s15 + $0x38] sm:$0xff]   ;;  %v4054_v3 = vmov 0.0   ;;  %v3630_v5 = vld [vmem:[%s4289_s15 + $0x30] sm:$0xff]   ;;  %vm4055_vm0 = vmmov 0   ;;  %v3632_v7 = vld [vmem:[%s4289_s15 + $0x28] sm:$0xff]   ;;  %v686_v22 = vlaneseq  ;;  %vm1035_vm1 = vcmask 261120  }
  0x9d   : > { %3353 = vmatprep.subr.bf16.mxu0 %v4054_v3  ;;  %3373 = vmatprep.subr.bf16.mxu1 %v4054_v3  ;;  %v3629_v4 = vld [vmem:[%s4296_s3 + $0x38] sm:$0xff]   ;;  %v3631_v6 = vld [vmem:[%s4296_s3 + $0x30] sm:$0xff]   ;;  %v3633_v8 = vld [vmem:[%s4296_s3 + $0x28] sm:$0xff]   ;;  %s4803_s19 = sld [smem:[#allocation27_spill]]  ;;  %vm1128_vm4 = vcmask 64512   ;;  %vm1156_vm5 = vcmask 1043456  }
  0x9e   : > { %3354 = vmatpush3.bf16.msra.mxu0 %v3628_v2  ;;  %3369 = vmatprep.mubr.msk.bf16.mxu0 %vm4055_vm0, %v4054_v3  ;;  %v3634_v9 = vld [vmem:[%s4289_s15 + $0x20] sm:$0xff]   ;;  %v3636_v11 = vld [vmem:[%s4289_s15 + $0x18] sm:$0xff]   ;;  %v3638_v13 = vld [vmem:[%s4289_s15 + $0x10] sm:$0xff]   ;;  %v4383_v23 = vshrl.u32 %v686_v22, 7  ;;  %vm1254_vm6 = vcmask 257024   ;;  %s4057_s18 = smov 64  }
  0x9f   : > { %3374 = vmatpush3.bf16.msra.mxu1 %v3629_v4  ;;  %3355 = vmatprep.subr.bf16.mxu0 %v4054_v3  ;;  %v3635_v10 = vld [vmem:[%s4296_s3 + $0x20] sm:$0xff]   ;;  %v3637_v12 = vld [vmem:[%s4296_s3 + $0x18] sm:$0xff]   ;;  %v3639_v14 = vld [vmem:[%s4296_s3 + $0x10] sm:$0xff]   ;;  %s4058_s27 = smov 32   ;;  %vm1489_vm7 = vcmask 519424   ;;  %vm1724_vm8 = vcmask 781824  }
  0xa0   : > { %3375 = vmatprep.subr.bf16.mxu1 %v4054_v3  ;;  %3389 = vmatprep.mubr.msk.bf16.mxu1 %vm4055_vm0, %v4054_v3  ;;  %v3640_v15 = vld [vmem:[%s4289_s15 + $0x8] sm:$0xff]   ;;  %v3642_v17 = vld [vmem:[%s4289_s15] sm:$0xff]   ;;  %v4386_v24 = vsub.s32 0, %v4383_v23  ;;  %v800_v25 = vsub.s32 1, %v4383_v23  ;;  %v4390_v26 = vld [vmem:[%s4323_s6] sm:$0xff]  ;;  %v910_v22 = vsub.s32 2, %v4383_v23 }
  0xa1   : > { %v3641_v16 = vld [vmem:[%s4296_s3 + $0x8] sm:$0xff]   ;;  %v3643_v20 = vld [vmem:[%s4296_s3] sm:$0xff]   ;;  %v3644_v49 = vld [vmem:[%s4302_s29 + $0x38] sm:$0xff]   ;;  %vm1959_vm9 = vcmask 1044224  }
  0xa2   : > { %3356 = vmatpush3.bf16.msra.mxu0 %v3630_v5  ;;  %v665_v18 = vld [vmem:[#allocation14] sm:$0xff]  ;;  %v666_v19 = vld [vmem:[#allocation14 + $0x8] sm:$0xff]  ;;  %v689_v27 = vrot.slane %v4390_v26, %v4386_v24  ;;  %v801_v28 = vrot.slane %v4390_v26, %v800_v25  ;;  %v3645_v50 = vld [vmem:[%s4302_s29 + $0x30] sm:$0xff]  }
  0xa3   : > { %3376 = vmatpush3.bf16.msra.mxu1 %v3631_v6  ;;  %3357 = vmatprep.subr.bf16.mxu0 %v4054_v3  ;;  %v4373_v21 = vpack.c.bf16 %v666_v19, %v665_v18  ;;  %v3646_v51 = vld [vmem:[%s4302_s29 + $0x28] sm:$0xff]   ;;  %v3647_v52 = vld [vmem:[%s4302_s29 + $0x20] sm:$0xff]   ;;  %v3648_v53 = vld [vmem:[%s4302_s29 + $0x18] sm:$0xff]  }
  0xa4   : > { %3377 = vmatprep.subr.bf16.mxu1 %v4054_v3  ;;  %v3649_v54 = vld [vmem:[%s4302_s29 + $0x10] sm:$0xff]   ;;  %v3650_v55 = vld [vmem:[%s4302_s29 + $0x8] sm:$0xff]   ;;  %v3651_v56 = vld [vmem:[%s4302_s29] sm:$0xff]   ;;  %s4056_s29 = smov 96  }
  0xa5   : > { %v1002_v57 = vld [vmem:[%s4803_s19] sm:$0x1]  ;;  %v1003_v59 = vld [vmem:[%s4803_s19 + $0x1] sm:$0x1] }
  0xa6   : > { %3358 = vmatpush3.bf16.msra.mxu0 %v3632_v7  ;;  %vm1004_vm2 = vcmp.eq.f32.partialorder %v1002_v57, 0.0  ;;  %vm1005_vm3 = vcmp.eq.f32.partialorder %v1003_v59, 0.0 }
  0xa7   : > { %3378 = vmatpush3.bf16.msra.mxu1 %v3633_v8  ;;  %3359 = vmatprep.subr.bf16.mxu0 %v4054_v3  ;;  %v1006_v58 = vsel %vm1004_vm2, -1e+20, %v4054_v3  ;;  %v1007_v0 = vsel %vm1005_vm3, -1e+20, %v4054_v3 }
  0xa8   : > { %3379 = vmatprep.subr.bf16.mxu1 %v4054_v3  ;;  %v4446_v60 = vrot.slane %v1006_v58, %v4386_v24  ;;  %v4452_v4 = vrot.slane %v1007_v0, %v4386_v24 }
  0xaa   : > { %3360 = vmatpush3.bf16.msra.mxu0 %v3634_v9 }
  0xab   : > { %3380 = vmatpush3.bf16.msra.mxu1 %v3635_v10  ;;  %3361 = vmatprep.subr.bf16.mxu0 %v4054_v3 }
  0xac   : > { %3381 = vmatprep.subr.bf16.mxu1 %v4054_v3 }
  0xae   : > { %3362 = vmatpush3.bf16.msra.mxu0 %v3636_v11 }
  0xaf   : > { %3382 = vmatpush3.bf16.msra.mxu1 %v3637_v12  ;;  %3363 = vmatprep.subr.bf16.mxu0 %v4054_v3 }
  0xb0   : > { %3383 = vmatprep.subr.bf16.mxu1 %v4054_v3 }
  0xb2   : > { %3364 = vmatpush3.bf16.msra.mxu0 %v3638_v13 }
  0xb3   : > { %3384 = vmatpush3.bf16.msra.mxu1 %v3639_v14  ;;  %3365 = vmatprep.subr.bf16.mxu0 %v4054_v3 }
  0xb4   : > { %3385 = vmatprep.subr.bf16.mxu1 %v4054_v3 }
  0xb6   : > { %3366 = vmatpush3.bf16.msra.mxu0 %v3640_v15 }
  0xb7   : > { %3386 = vmatpush3.bf16.msra.mxu1 %v3641_v16  ;;  %3367 = vmatprep.subr.bf16.mxu0 %v4054_v3 }
  0xb8   : > { %3387 = vmatprep.subr.bf16.mxu1 %v4054_v3 }
  0xba   : > { %3368 = vmatpush3.bf16.msra.mxu0 %v3642_v17 }
  0xbb   : > { %3388 = vmatpush3.bf16.msra.mxu1 %v3643_v20  ;;  %3393 = vmatprep.subr.bf16.mxu0 %v4054_v3 }
  0xbc   : > { %3413 = vmatprep.subr.bf16.mxu1 %v4054_v3 }
  0xbd   : > { %3370 = vmatmul.mubr.bf16.vlgmr.msra.gmra.mxu0 %v4373_v21 }
  0xbe   : > { %3390 = vmatmul.mubr.bf16.vlgmr.msra.gmra.mxu1 %v4373_v21  ;;  %3409 = vmatprep.mubr.msk.bf16.mxu0 %vm4055_vm0, %v4054_v3 }
  0xbf   : > { %3415 = vmatprep.mubr.msk.bf16.mxu1 %vm4055_vm0, %v4054_v3  ;;  %3394 = vmatpush3.bf16.msra.mxu0 %v3644_v49 }
  0xc0   : > { %3395 = vmatprep.subr.bf16.mxu0 %v4054_v3 }
  0xc3   : > { %3396 = vmatpush3.bf16.msra.mxu0 %v3645_v50 }
  0xc4   : > { %3397 = vmatprep.subr.bf16.mxu0 %v4054_v3 }
  0xc7   : > { %3398 = vmatpush3.bf16.msra.mxu0 %v3646_v51 }
  0xc8   : > { %3399 = vmatprep.subr.bf16.mxu0 %v4054_v3 }
  0xcb   : > { %3400 = vmatpush3.bf16.msra.mxu0 %v3647_v52 }
  0xcc   : > { %3401 = vmatprep.subr.bf16.mxu0 %v4054_v3 }
  0xcf   : > { %3402 = vmatpush3.bf16.msra.mxu0 %v3648_v53 }
  0xd0   : > { %3403 = vmatprep.subr.bf16.mxu0 %v4054_v3 }
  0xd3   : > { %3404 = vmatpush3.bf16.msra.mxu0 %v3649_v54 }
  0xd4   : > { %3405 = vmatprep.subr.bf16.mxu0 %v4054_v3 }
  0xd7   : > { %3406 = vmatpush3.bf16.msra.mxu0 %v3650_v55 }
  0xd8   : > { %3407 = vmatprep.subr.bf16.mxu0 %v4054_v3 }
  0xdb   : > { %3408 = vmatpush3.bf16.msra.mxu0 %v3651_v56 }
  0xdc   : > { %3461 = vmatprep.subr.bf16.mxu0 %v4054_v3 }
  0xde   : > { %3410 = vmatmul.mubr.bf16.vlgmr.msra.gmra.mxu0 %v4373_v21 }
  0xdf   : > { %3463 = vmatprep.mubr.msk.bf16.mxu0 %vm4055_vm0, %v4054_v3 }
 0x17d   : > { %v772_v29 = vpop.f32.mrf.mxu0 }
 0x17e   : > { %v884_v30 = vpop.f32.mrf.mxu1  ;;  %v773_v31 = vadd.f32 %v772_v29, %v689_v27 }
 0x17f   : > { %v885_v32 = vadd.f32 %v884_v30, %v801_v28  ;;  %v3371_v33 = vpop.f32.mrf.mxu0 }
 0x180   : > { %v3391_v34 = vpop.f32.mrf.mxu1  ;;  %v779_v38 = vmul.f32 0.088388346, %v773_v31 }
 0x181   : > { %v4397_v35 = vpack.c.bf16 %v885_v32, %v885_v32  ;;  %v775_v36 = vpop.f32.mrf.mxu0 }
 0x182   : > { %v887_v37 = vpop.f32.mrf.mxu1  ;;  %v4402_v43 = vpack.c.bf16 %v779_v38, %v779_v38  ;;  %v776_v45 = vadd.f32 %v775_v36, %v689_v27 }
 0x183   : > { %v888_v39 = vadd.f32 %v887_v37, %v801_v28  ;;  %v3372_v40 = vpop.f32.mrf.mxu0  ;;  %v1040_v41 = vsel %vm1035_vm1, %v4397_v35, 0  ;;  %v911_v28 = vrot.slane %v4390_v26, %v910_v22 }
 0x184   : > { %v3392_v42 = vpop.f32.mrf.mxu1  ;;  %3414 = vmatpush3.bf16.xpose.msra.mxu1 %v1040_v41  ;;  %v780_v47 = vmul.f32 0.088388346, %v776_v45 }
 0x185   : > { %3419 = vmatprep.subr.bf16.mxu1 %v4054_v3  ;;  %v4404_v44 = vpack.c.bf16 %v888_v39, %v888_v39 }
 0x186   : > { %v4413_v48 = vpack.c.bf16 %v780_v47, %v780_v47 }
 0x187   : > { %v1086_v46 = vsel %vm1035_vm1, %v4404_v44, 0 }
 0x18b   : > { %3416 = vmatmul.mubr.msk.bf16.vlgmr.msra.gmra.mxu1 %vm1035_vm1, %v4402_v43 }
 0x18c   : > { %3420 = vmatpush3.bf16.xpose.msra.mxu1 %v1086_v46  ;;  %3421 = vmatprep.mubr.msk.bf16.mxu1 %vm4055_vm0, %v4054_v3 }
 0x18d   : > { %3425 = vmatprep.subr.bf16.mxu1 %v4054_v3 }
 0x193   : > { %3422 = vmatmul.mubr.msk.bf16.vlgmr.msra.gmra.mxu1 %vm1035_vm1, %v4413_v48 }
 0x194   : > { %3427 = vmatprep.mubr.msk.bf16.mxu1 %vm4055_vm0, %v4054_v3 }
 0x19e   : > { %v994_v27 = vpop.f32.mrf.mxu0 }
 0x19f   : > { %v995_v30 = vadd.f32 %v994_v27, %v911_v28 }
 0x1a0   : > { %v3411_v29 = vpop.f32.mrf.mxu0 }
 0x1a1   : > { %v4464_v34 = vpack.c.bf16 %v995_v30, %v995_v30 }
 0x1a2   : > { %v997_v31 = vpop.f32.mrf.mxu0 }
 0x1a3   : > { %v998_v32 = vadd.f32 %v997_v31, %v911_v28  ;;  %v1158_v36 = vsel %vm1156_vm5, %v4464_v34, 0 }
 0x1a4   : > { %v3412_v33 = vpop.f32.mrf.mxu0  ;;  %3426 = vmatpush3.bf16.msra.mxu1 %v1158_v36 }
 0x1a5   : > { %3431 = vmatprep.subr.bf16.mxu1 %v4054_v3  ;;  %v4475_v40 = vpack.c.bf16 %v998_v32, %v998_v32 }
 0x1a7   : > { %v1204_v45 = vsel %vm1156_vm5, %v4475_v40, 0 }
 0x24b   : > { %v1076_v61 = vpop.f32.mrf.mxu1 }
 0x24c   : > { %v1077_v62 = vadd.f32 %v1076_v61, %v4446_v60 }
 0x24d   : > { %v3417_v63 = vpop.f32.mrf.mxu1 }
 0x24e   : > { %v1129_v1 = vsel %vm1128_vm4, %v1077_v62, -inf }
 0x24f   : > { %1130 = vmax.xlane.f32.xlu0 %v1129_v1  ;;  %v1079_v2 = vpop.f32.mrf.mxu1 }
 0x251   : > { %v3418_v5 = vpop.f32.mrf.mxu1 }
 0x253   : > { %v1122_v6 = vpop.f32.mrf.mxu1 }
 0x254   : > { %v1123_v7 = vadd.f32 %v1122_v6, %v4452_v4 }
 0x255   : > { %v3423_v8 = vpop.f32.mrf.mxu1 }
 0x256   : > { %v1132_v9 = vsel %vm1128_vm4, %v1123_v7, -inf }
 0x257   : > { %1133 = vmax.xlane.f32.xlu0 %v1132_v9  ;;  %v1125_v10 = vpop.f32.mrf.mxu1 }
 0x259   : > { %v3424_v11 = vpop.f32.mrf.mxu1 }
 0x26d   : > { %1259 = vrot.lane.b32.xlu0 %v4397_v35, %s4056_s29 }
 0x2d8   : > { %v1131_v12 = vpop.xlane.xlu0 %1130 }
 0x2d9   : > { %v1135_v13 = vsub.f32 %v1077_v62, %v1131_v12 }
 0x2db   : > { %v1137_v14 = vmul.f32 1.442695, %v1135_v13 }
 0x2dd   : > { %3741 = vpow2.f32 %v1137_v14 }
 0x2e0   : > { %v1134_v15 = vpop.xlane.xlu0 %1133 }
 0x2e1   : > { %v1136_v16 = vsub.f32 %v1123_v7, %v1134_v15 }
 0x2e3   : > { %v1139_v17 = vmul.f32 1.442695, %v1136_v16 }
 0x2e4   : > { %v1260_v49 = vpop.permute.xlu0 %1259 }
 0x2e5   : > { %3743 = vpow2.f32 %v1139_v17  ;;  %v1265_v52 = vsel %vm1035_vm1, %v1260_v49, 0 }
 0x2ea   : > { %v3742_v18 = vpop.eup %3741 }
 0x2eb   : > { %v1141_v19 = vsel %vm1128_vm4, %v3742_v18, 0.0 }
 0x2ec   : > { %1142 = vadd.xlane.f32.xlu1 %v1141_v19 }
 0x2f2   : > { %v3744_v20 = vpop.eup %3743 }
 0x2f3   : > { %v1144_v21 = vsel %vm1128_vm4, %v3744_v20, 0.0 }
 0x2f4   : > { %1145 = vadd.xlane.f32.xlu1 %v1144_v21 }
 0x305   : > { %1257 = vrot.lane.b32.xlu1 %v4402_v43, %s4056_s29 }
 0x309   : > { %1309 = vrot.lane.b32.xlu1 %v4404_v44, %s4056_s29 }
 0x30d   : > { %1307 = vrot.lane.b32.xlu1 %v4413_v48, %s4056_s29 }
 0x375   : > { %v1143_v37 = vpop.xlane.xlu1 %1142 }
 0x376   : > { %3745 = vrcp.f32 %v1143_v37 }
 0x37d   : > { %v1146_v38 = vpop.xlane.xlu1 %1145 }
 0x37e   : > { %3747 = vrcp.f32 %v1146_v38 }
 0x381   : > { %v1258_v51 = vpop.permute.xlu1 %1257 }
 0x383   : > { %v3746_v39 = vpop.eup %3745 }
 0x384   : > { %v1149_v41 = vmul.f32 %v3746_v39, %v3742_v18 }
 0x385   : > { %v1310_v53 = vpop.permute.xlu1 %1309 }
 0x386   : > { %v1151_v42 = vpack.c.bf16 %v1149_v41, %v1149_v41  ;;  %v1315_v54 = vsel %vm1035_vm1, %v1310_v53, 0 }
 0x388   : > { %3428 = vmatmul.mubr.msk.bf16.vlgmr.msra.gmra.mxu1 %vm1128_vm4, %v1151_v42 }
 0x389   : > { %3432 = vmatpush3.bf16.msra.mxu1 %v1204_v45  ;;  %3433 = vmatprep.mubr.msk.bf16.mxu1 %vm4055_vm0, %v4054_v3  ;;  %v1308_v55 = vpop.permute.xlu1 %1307 }
 0x38a   : > { %3437 = vmatprep.subr.bf16.mxu1 %v4054_v3 }
 0x38b   : > { %v3748_v46 = vpop.eup %3747 }
 0x38c   : > { %v1150_v47 = vmul.f32 %v3748_v46, %v3744_v20 }
 0x38e   : > { %v1152_v50 = vpack.c.bf16 %v1150_v47, %v1150_v47 }
 0x390   : > { %3434 = vmatmul.mubr.msk.bf16.vlgmr.msra.gmra.mxu1 %vm1128_vm4, %v1152_v50 }
 0x391   : > { %3438 = vmatpush3.bf16.xpose.msra.mxu1 %v1265_v52  ;;  %3439 = vmatprep.mubr.msk.bf16.mxu1 %vm4055_vm0, %v4054_v3 }
 0x392   : > { %3443 = vmatprep.subr.bf16.mxu1 %v4054_v3 }
 0x398   : > { %3440 = vmatmul.mubr.msk.bf16.vlgmr.msra.gmra.mxu1 %vm1035_vm1, %v1258_v51 }
 0x399   : > { %3444 = vmatpush3.bf16.xpose.msra.mxu1 %v1315_v54  ;;  %3445 = vmatprep.mubr.msk.bf16.mxu1 %vm4055_vm0, %v4054_v3 }
 0x39a   : > { %3449 = vmatprep.subr.bf16.mxu1 %v4054_v3 }
 0x3a0   : > { %3446 = vmatmul.mubr.msk.bf16.vlgmr.msra.gmra.mxu1 %vm1035_vm1, %v1308_v55 }
 0x3a1   : > { %3451 = vmatprep.mubr.msk.bf16.mxu1 %vm4055_vm0, %v4054_v3 }
 0x448   : > { %v1194_v56 = vpop.f32.mrf.mxu1 }
 0x449   : > { %v3233_v57 = vpack.c.bf16 %v1194_v56, %v1194_v56 }
 0x44a   : > { %v3429_v58 = vpop.f32.mrf.mxu1 }
 0x44b   : > { %1255 = vst.msk [vmem:[#allocation2] sm:$0xf] %vm1254_vm6, %v3233_v57 }
 0x44c   : > { %v1197_v59 = vpop.f32.mrf.mxu1 }
 0x44e   : > { %v3430_v61 = vpop.f32.mrf.mxu1 }
 0x450   : > { %v1240_v62 = vpop.f32.mrf.mxu1 }
 0x451   : > { %v3234_v63 = vpack.c.bf16 %v1240_v62, %v1240_v62 }
 0x452   : > { %v3435_v0 = vpop.f32.mrf.mxu1 }
 0x453   : > { %1256 = vst.msk [vmem:[#allocation2 + $0x4] sm:$0xf] %vm1254_vm6, %v3234_v63 }
 0x454   : > { %v1243_v1 = vpop.f32.mrf.mxu1 }
 0x456   : > { %v3436_v2 = vpop.f32.mrf.mxu1 }
 0x458   : > { %v1301_v5 = vpop.f32.mrf.mxu1 }
 0x459   : > { %v1302_v6 = vadd.f32 %v1301_v5, %v4446_v60 }
 0x45a   : > { %v3441_v7 = vpop.f32.mrf.mxu1 }
 0x45b   : > { %v1357_v8 = vsel %vm1128_vm4, %v1302_v6, -inf }
 0x45c   : > { %1358 = vmax.xlane.f32.xlu0 %v1357_v8  ;;  %v1304_v9 = vpop.f32.mrf.mxu1 }
 0x45e   : > { %v3442_v10 = vpop.f32.mrf.mxu1 }
 0x460   : > { %v1351_v11 = vpop.f32.mrf.mxu1 }
 0x461   : > { %v1352_v12 = vadd.f32 %v1351_v11, %v4452_v4 }
 0x462   : > { %v3447_v13 = vpop.f32.mrf.mxu1 }
 0x463   : > { %v1360_v14 = vsel %vm1128_vm4, %v1352_v12, -inf }
 0x464   : > { %1361 = vmax.xlane.f32.xlu1 %v1360_v14  ;;  %v1354_v15 = vpop.f32.mrf.mxu1 }
 0x466   : > { %v3448_v16 = vpop.f32.mrf.mxu1 }
 0x475   : > { %1429 = vrot.lane.b32.xlu1 %v4475_v40, %s4056_s29 }
 0x479   : > { %1494 = vrot.lane.b32.xlu1 %v4397_v35, %s4057_s18 }
 0x47d   : > { %1544 = vrot.lane.b32.xlu1 %v4404_v44, %s4057_s18 }
 0x481   : > { %1542 = vrot.lane.b32.xlu1 %v4413_v48, %s4057_s18 }
 0x4e5   : > { %v1359_v17 = vpop.xlane.xlu0 %1358 }
 0x4e6   : > { %v1363_v18 = vsub.f32 %v1302_v6, %v1359_v17 }
 0x4e8   : > { %v1365_v19 = vmul.f32 1.442695, %v1363_v18 }
 0x4ea   : > { %3749 = vpow2.f32 %v1365_v19 }
 0x4ed   : > { %v1362_v20 = vpop.xlane.xlu1 %1361 }
 0x4ee   : > { %v1364_v21 = vsub.f32 %v1352_v12, %v1362_v20 }
 0x4f0   : > { %v1367_v27 = vmul.f32 1.442695, %v1364_v21 }
 0x4f1   : > { %v1430_v28 = vpop.permute.xlu1 %1429 }
 0x4f2   : > { %3751 = vpow2.f32 %v1367_v27  ;;  %v1435_v49 = vsel %vm1156_vm5, %v1430_v28, 0 }
 0x4f5   : > { %v1495_v29 = vpop.permute.xlu1 %1494 }
 0x4f6   : > { %v1500_v30 = vsel %vm1035_vm1, %v1495_v29, 0 }
 0x4f7   : > { %v3750_v31 = vpop.eup %3749  ;;  %3462 = vmatpush3.bf16.xpose.msra.mxu0 %v1500_v30 }
 0x4f8   : > { %v1369_v32 = vsel %vm1128_vm4, %v3750_v31, 0.0  ;;  %3473 = vmatprep.subr.bf16.mxu0 %v4054_v3 }
 0x4f9   : > { %1370 = vadd.xlane.f32.xlu0 %v1369_v32  ;;  %v1545_v52 = vpop.permute.xlu1 %1544 }
 0x4fa   : > { %v1550_v54 = vsel %vm1035_vm1, %v1545_v52, 0 }
 0x4fd   : > { %v1543_v55 = vpop.permute.xlu1 %1542 }
 0x4ff   : > { %v3752_v33 = vpop.eup %3751 }
 0x500   : > { %v1372_v36 = vsel %vm1128_vm4, %v3752_v33, 0.0 }
 0x501   : > { %1373 = vadd.xlane.f32.xlu0 %v1372_v36 }
 0x517   : > { %1381 = vrot.lane.b32.xlu0 %v4464_v34, %s4056_s29 }
 0x51b   : > { %1492 = vrot.lane.b32.xlu0 %v4402_v43, %s4057_s18 }
 0x582   : > { %v1371_v37 = vpop.xlane.xlu0 %1370 }
 0x583   : > { %3753 = vrcp.f32 %v1371_v37 }
 0x58a   : > { %v1374_v38 = vpop.xlane.xlu0 %1373 }
 0x58b   : > { %3755 = vrcp.f32 %v1374_v38 }
 0x58e   : > { %v1382_v39 = vpop.permute.xlu0 %1381 }
 0x58f   : > { %v1387_v41 = vsel %vm1156_vm5, %v1382_v39, 0 }
 0x590   : > { %v3754_v42 = vpop.eup %3753  ;;  %3450 = vmatpush3.bf16.msra.mxu1 %v1387_v41 }
 0x591   : > { %3455 = vmatprep.subr.bf16.mxu1 %v4054_v3  ;;  %v1377_v45 = vmul.f32 %v3754_v42, %v3750_v31 }
 0x592   : > { %v1493_v46 = vpop.permute.xlu0 %1492 }
 0x593   : > { %3464 = vmatmul.mubr.msk.bf16.vlgmr.msra.gmra.mxu0 %vm1035_vm1, %v1493_v46  ;;  %v1379_v47 = vpack.c.bf16 %v1377_v45, %v1377_v45 }
 0x594   : > { %3475 = vmatprep.mubr.msk.bf16.mxu0 %vm4055_vm0, %v4054_v3 }
 0x595   : > { %3452 = vmatmul.mubr.msk.bf16.vlgmr.msra.gmra.mxu1 %vm1128_vm4, %v1379_v47 }
 0x596   : > { %3456 = vmatpush3.bf16.msra.mxu1 %v1435_v49  ;;  %3457 = vmatprep.mubr.msk.bf16.mxu1 %vm4055_vm0, %v4054_v3 }
 0x597   : > { %3467 = vmatprep.subr.bf16.mxu1 %v4054_v3 }
 0x598   : > { %v3756_v50 = vpop.eup %3755 }
 0x599   : > { %v1378_v51 = vmul.f32 %v3756_v50, %v3752_v33 }
 0x59b   : > { %v1380_v53 = vpack.c.bf16 %v1378_v51, %v1378_v51 }
 0x59d   : > { %3458 = vmatmul.mubr.msk.bf16.vlgmr.msra.gmra.mxu1 %vm1128_vm4, %v1380_v53 }
 0x59e   : > { %3468 = vmatpush3.bf16.xpose.msra.mxu1 %v1550_v54  ;;  %3469 = vmatprep.mubr.msk.bf16.mxu1 %vm4055_vm0, %v4054_v3 }
 0x59f   : > { %3479 = vmatprep.subr.bf16.mxu1 %v4054_v3 }
 0x5a5   : > { %3470 = vmatmul.mubr.msk.bf16.vlgmr.msra.gmra.mxu1 %vm1035_vm1, %v1543_v55 }
 0x5a6   : > { %3481 = vmatprep.mubr.msk.bf16.mxu1 %vm4055_vm0, %v4054_v3 }
 0x653   : > { %v1536_v56 = vpop.f32.mrf.mxu0 }
 0x654   : > { %v1537_v57 = vadd.f32 %v1536_v56, %v4446_v60 }
 0x655   : > { %v4535_v58 = vpop.f32.mrf.mxu1  ;;  %v3465_v59 = vpop.f32.mrf.mxu0 }
 0x656   : > { %v1592_v61 = vsel %vm1128_vm4, %v1537_v57, -inf }
 0x657   : > { %v3453_v62 = vpop.f32.mrf.mxu1  ;;  %1593 = vmax.xlane.f32.xlu0 %v1592_v61  ;;  %v1539_v63 = vpop.f32.mrf.mxu0 }
 0x659   : > { %v1426_v0 = vpop.f32.mrf.mxu1  ;;  %v3466_v1 = vpop.f32.mrf.mxu0 }
 0x65b   : > { %v3454_v2 = vpop.f32.mrf.mxu1 }
 0x65d   : > { %v4538_v5 = vpop.f32.mrf.mxu1 }
 0x65f   : > { %v3459_v6 = vpop.f32.mrf.mxu1 }
 0x661   : > { %v1474_v7 = vpop.f32.mrf.mxu1 }
 0x663   : > { %v3460_v8 = vpop.f32.mrf.mxu1 }
 0x665   : > { %v1586_v9 = vpop.f32.mrf.mxu1 }
 0x666   : > { %v1587_v10 = vadd.f32 %v1586_v9, %v4452_v4 }
 0x667   : > { %v3471_v11 = vpop.f32.mrf.mxu1 }
 0x668   : > { %v1595_v12 = vsel %vm1128_vm4, %v1587_v10, -inf  ;;  %v3236_v11 = vpack.c.bf16 %v4538_v5, %v4538_v5 }
 0x669   : > { %1596 = vmax.xlane.f32.xlu1 %v1595_v12  ;;  %v1589_v13 = vpop.f32.mrf.mxu1 }
 0x66b   : > { %v3472_v14 = vpop.f32.mrf.mxu1 }
 0x67a   : > { %1664 = vrot.lane.b32.xlu1 %v4475_v40, %s4057_s18 }
 0x67e   : > { %1729 = vrot.lane.b32.xlu1 %v4397_v35, %s4058_s27 }
 0x682   : > { %1779 = vrot.lane.b32.xlu1 %v4404_v44, %s4058_s27 }
 0x686   : > { %1777 = vrot.lane.b32.xlu1 %v4413_v48, %s4058_s27 }
 0x6e0   : > { %v1594_v15 = vpop.xlane.xlu0 %1593 }
 0x6e1   : > { %v1598_v16 = vsub.f32 %v1537_v57, %v1594_v15 }
 0x6e3   : > { %v1600_v17 = vmul.f32 1.442695, %v1598_v16 }
 0x6e5   : > { %3757 = vpow2.f32 %v1600_v17 }
 0x6f2   : > { %v3758_v18 = vpop.eup %3757  ;;  %v1597_v19 = vpop.xlane.xlu1 %1596 }
 0x6f3   : > { %v1599_v20 = vsub.f32 %v1587_v10, %v1597_v19  ;;  %v1604_v21 = vsel %vm1128_vm4, %v3758_v18, 0.0 }
 0x6f4   : > { %1605 = vadd.xlane.f32.xlu0 %v1604_v21 }
 0x6f5   : > { %v1602_v27 = vmul.f32 1.442695, %v1599_v20 }
 0x6f6   : > { %v1665_v28 = vpop.permute.xlu1 %1664 }
 0x6f7   : > { %3759 = vpow2.f32 %v1602_v27  ;;  %v1670_v35 = vsel %vm1156_vm5, %v1665_v28, 0 }
 0x6f8   : > { %3480 = vmatpush3.bf16.msra.mxu1 %v1670_v35 }
 0x6f9   : > { %3491 = vmatprep.subr.bf16.mxu1 %v4054_v3 }
 0x6fa   : > { %v1730_v37 = vpop.permute.xlu1 %1729 }
 0x6fb   : > { %v1735_v39 = vsel %vm1035_vm1, %v1730_v37, 0 }
 0x6fe   : > { %v1780_v42 = vpop.permute.xlu1 %1779 }
 0x6ff   : > { %v1785_v47 = vsel %vm1035_vm1, %v1780_v42, 0  ;;  %v3655_v42 = vld [vmem:[%s4304_s11 + $0x20] sm:$0xff]  }
 0x702   : > { %v1778_v49 = vpop.permute.xlu1 %1777 }
 0x704   : > { %v3760_v44 = vpop.eup %3759 }
 0x705   : > { %v1607_v48 = vsel %vm1128_vm4, %v3760_v44, 0.0 }
 0x706   : > { %1608 = vadd.xlane.f32.xlu0 %v1607_v48 }
 0x71c   : > { %1616 = vrot.lane.b32.xlu0 %v4464_v34, %s4057_s18 }
 0x720   : > { %1727 = vrot.lane.b32.xlu0 %v4402_v43, %s4058_s27 }
 0x77d   : > { %v1606_v29 = vpop.xlane.xlu0 %1605 }
 0x77e   : > { %3761 = vrcp.f32 %v1606_v29 }
 0x78b   : > { %v3762_v30 = vpop.eup %3761 }
 0x78c   : > { %v1612_v32 = vmul.f32 %v3762_v30, %v3758_v18 }
 0x78e   : > { %v1614_v38 = vpack.c.bf16 %v1612_v32, %v1612_v32 }
 0x78f   : > { %v1609_v31 = vpop.xlane.xlu0 %1608 }
 0x790   : > { %3763 = vrcp.f32 %v1609_v31 }
 0x793   : > { %v1617_v33 = vpop.permute.xlu0 %1616 }
 0x794   : > { %v1622_v36 = vsel %vm1156_vm5, %v1617_v33, 0 }
 0x795   : > { %3474 = vmatpush3.bf16.msra.mxu0 %v1622_v36 }
 0x796   : > { %3485 = vmatprep.subr.bf16.mxu0 %v4054_v3 }
 0x797   : > { %v1728_v45 = vpop.permute.xlu0 %1727 }
 0x798   : > { %3476 = vmatmul.mubr.msk.bf16.vlgmr.msra.gmra.mxu0 %vm1128_vm4, %v1614_v38 }
 0x799   : > { %3486 = vmatpush3.bf16.xpose.msra.mxu0 %v1735_v39  ;;  %3487 = vmatprep.mubr.msk.bf16.mxu0 %vm4055_vm0, %v4054_v3  ;;  %v3652_v39 = vld [vmem:[%s4304_s11 + $0x38] sm:$0xff]  }
 0x79a   : > { %3497 = vmatprep.subr.bf16.mxu0 %v4054_v3 }
 0x79d   : > { %v3764_v43 = vpop.eup %3763 }
 0x79e   : > { %v1613_v41 = vmul.f32 %v3764_v43, %v3760_v44  ;;  %v3653_v43 = vld [vmem:[%s4304_s11 + $0x30] sm:$0xff]  }
 0x7a0   : > { %3488 = vmatmul.mubr.msk.bf16.vlgmr.msra.gmra.mxu0 %vm1035_vm1, %v1728_v45  ;;  %v1615_v46 = vpack.c.bf16 %v1613_v41, %v1613_v41  ;;  %v3654_v41 = vld [vmem:[%s4304_s11 + $0x28] sm:$0xff]   ;;  %v3656_v45 = vld [vmem:[%s4304_s11 + $0x18] sm:$0xff]  }
 0x7a1   : > { %3499 = vmatprep.mubr.msk.bf16.mxu0 %vm4055_vm0, %v4054_v3 }
 0x7a2   : > { %3482 = vmatmul.mubr.msk.bf16.vlgmr.msra.gmra.mxu1 %vm1128_vm4, %v1615_v46  ;;  %v3657_v46 = vld [vmem:[%s4304_s11 + $0x10] sm:$0xff]  }
 0x7a3   : > { %3492 = vmatpush3.bf16.xpose.msra.mxu1 %v1785_v47  ;;  %3493 = vmatprep.mubr.msk.bf16.mxu1 %vm4055_vm0, %v4054_v3 }
 0x7a4   : > { %3503 = vmatprep.subr.bf16.mxu1 %v4054_v3 }
 0x7aa   : > { %3494 = vmatmul.mubr.msk.bf16.vlgmr.msra.gmra.mxu1 %vm1035_vm1, %v1778_v49  ;;  %v3658_v49 = vld [vmem:[%s4304_s11 + $0x8] sm:$0xff]  }
 0x7ab   : > { %3505 = vmatprep.mubr.msk.bf16.mxu1 %vm4055_vm0, %v4054_v3 }
 0x858   : > { %v1658_v50 = vpop.f32.mrf.mxu0 }
 0x859   : > { %v3237_v35 = vpack.c.bf16 %v1658_v50, %v1658_v50 }
 0x85a   : > { %v3477_v51 = vpop.f32.mrf.mxu0 }
 0x85c   : > { %v1661_v52 = vpop.f32.mrf.mxu0 }
 0x85d   : > { %v3659_v52 = vld [vmem:[%s4304_s11] sm:$0xff]   ;;  %s4804_s11 = sld [smem:[#allocation23_spill]] }
 0x85e   : > { %v3478_v53 = vpop.f32.mrf.mxu0 }
 0x860   : > { %v1771_v54 = vpop.f32.mrf.mxu0 }
 0x861   : > { %v1772_v55 = vadd.f32 %v1771_v54, %v4446_v60  ;;  %v3235_v60 = vpack.c.bf16 %v4535_v58, %v4535_v58 }
 0x862   : > { %v1706_v56 = vpop.f32.mrf.mxu1  ;;  %v3489_v57 = vpop.f32.mrf.mxu0 }
 0x863   : > { %v1827_v59 = vsel %vm1128_vm4, %v1772_v55, -inf  ;;  %p3565_p7 = scmp.eq.s32.totalorder %s4804_s11, 1 }
 0x864   : > { %v3483_v61 = vpop.f32.mrf.mxu1  ;;  %1828 = vmax.xlane.f32.xlu0 %v1827_v59  ;;  %v1774_v62 = vpop.f32.mrf.mxu0 }
 0x866   : > { %v1709_v63 = vpop.f32.mrf.mxu1  ;;  %v3490_v0 = vpop.f32.mrf.mxu0 }
 0x868   : > { %v3484_v1 = vpop.f32.mrf.mxu1 }
 0x869   : > { %v1982_v1 = vsub.s32 3, %v4383_v23 }
 0x86a   : > { %v1821_v2 = vpop.f32.mrf.mxu1 }
 0x86b   : > { %v1822_v6 = vadd.f32 %v1821_v2, %v4452_v4  ;;  %v3238_v4 = vpack.c.bf16 %v1706_v56, %v1706_v56 }
 0x86c   : > { %v3495_v7 = vpop.f32.mrf.mxu1 }
 0x86d   : > { %v1830_v8 = vsel %vm1128_vm4, %v1822_v6, -inf }
 0x86e   : > { %1831 = vmax.xlane.f32.xlu1 %v1830_v8  ;;  %v1824_v9 = vpop.f32.mrf.mxu1  ;;  %v3781_v8 = vld [vmem:[#allocation14] sm:$0xff] }
 0x870   : > { %v3496_v10 = vpop.f32.mrf.mxu1 }
 0x87f   : > { %1899 = vrot.lane.b32.xlu1 %v4475_v40, %s4058_s27 }
 0x883   : > { %1483 = vrot.lane.b32.xlu1 %v3235_v60, %s4058_s27 }
 0x887   : > { %1485 = vrot.lane.b32.xlu1 %v3236_v11, %s4058_s27 }
 0x88b   : > { %1720 = vrot.lane.b32.xlu1 %v3238_v4, %s4057_s18  ;;  %v3782_v4 = vld [vmem:[#allocation14 + $0x8] sm:$0xff] }
 0x8ed   : > { %v1829_v12 = vpop.xlane.xlu0 %1828 }
 0x8ee   : > { %v1833_v13 = vsub.f32 %v1772_v55, %v1829_v12 }
 0x8f0   : > { %v1835_v14 = vmul.f32 1.442695, %v1833_v13 }
 0x8f2   : > { %3765 = vpow2.f32 %v1835_v14  ;;  %v3663_v14 = vld [vmem:[%s4310_s5 + $0xe4] ss:$16 sps:$4 sm:$0xff]  }
 0x8f7   : > { %v1832_v15 = vpop.xlane.xlu1 %1831 }
 0x8f8   : > { %v1834_v16 = vsub.f32 %v1822_v6, %v1832_v15  ;;  %v3666_v15 = vld [vmem:[%s4310_s5 + $0xec] ss:$16 sps:$4 sm:$0xff]  }
 0x8fa   : > { %v1837_v40 = vmul.f32 1.442695, %v1834_v16  ;;  %v3661_v16 = vld [vmem:[%s4310_s5 + $0xe0] ss:$16 sps:$4 sm:$0xff]  }
 0x8fb   : > { %v1900_v17 = vpop.permute.xlu1 %1899 }
 0x8fc   : > { %3767 = vpow2.f32 %v1837_v40  ;;  %v1905_v58 = vsel %vm1156_vm5, %v1900_v17, 0  ;;  %v3664_v40 = vld [vmem:[%s4310_s5 + $0xe8] ss:$16 sps:$4 sm:$0xff]   ;;  %v3669_v17 = vld [vmem:[%s4310_s5 + $0xc4] ss:$16 sps:$4 sm:$0xff]  }
 0x8fd   : > { %3504 = vmatpush3.bf16.msra.mxu1 %v1905_v58  ;;  %v3672_v58 = vld [vmem:[%s4310_s5 + $0xcc] ss:$16 sps:$4 sm:$0xff]  }
 0x8fe   : > { %2337 = vmatprep.subr.bf16.mxu1 %v3663_v14  ;;  %v2118_v14 = vsub.s32 5, %v4383_v23 }
 0x8ff   : > { %v3766_v18 = vpop.eup %3765  ;;  %v1484_v5 = vpop.permute.xlu1 %1483 }
 0x900   : > { %1490 = vst.msk [vmem:[#allocation2] sm:$0xf] %vm1489_vm7, %v1484_v5  ;;  %v1839_v19 = vsel %vm1128_vm4, %v3766_v18, 0.0  ;;  %v3670_v5 = vld [vmem:[%s4310_s5 + $0xc8] ss:$16 sps:$4 sm:$0xff]  }
 0x901   : > { %1840 = vadd.xlane.f32.xlu0 %v1839_v19  ;;  %v3675_v19 = vld [vmem:[%s4310_s5 + $0xa4] ss:$16 sps:$4 sm:$0xff]  }
 0x903   : > { %v1486_v20 = vpop.permute.xlu1 %1485 }
 0x904   : > { %1491 = vst.msk [vmem:[#allocation2 + $0x4] sm:$0xf] %vm1489_vm7, %v1486_v20  ;;  %v3678_v20 = vld [vmem:[%s4310_s5 + $0xac] ss:$16 sps:$4 sm:$0xff]  }
 0x907   : > { %v1721_v21 = vpop.permute.xlu1 %1720 }
 0x908   : > { %1726 = vst.msk [vmem:[#allocation2 + $0x4] sm:$0xf] %vm1724_vm8, %v1721_v21  ;;  %v3673_v21 = vld [vmem:[%s4310_s5 + $0xa0] ss:$16 sps:$4 sm:$0xff]  }
 0x909   : > { %v3768_v27 = vpop.eup %3767 }
 0x90a   : > { %v1842_v28 = vsel %vm1128_vm4, %v3768_v27, 0.0 }
 0x90b   : > { %1843 = vadd.xlane.f32.xlu0 %v1842_v28  ;;  %v3679_v28 = vld [vmem:[%s4310_s5 + $0x80] ss:$16 sps:$4 sm:$0xff]  }
 0x921   : > { %1851 = vrot.lane.b32.xlu0 %v4464_v34, %s4058_s27 }
 0x925   : > { %1718 = vrot.lane.b32.xlu0 %v3237_v35, %s4057_s18  ;;  %v3681_v35 = vld [vmem:[%s4310_s5 + $0x84] ss:$16 sps:$4 sm:$0xff]  }
 0x98a   : > { %v1841_v44 = vpop.xlane.xlu0 %1840 }
 0x98b   : > { %3769 = vrcp.f32 %v1841_v44  ;;  %v3682_v44 = vld [vmem:[%s4310_s5 + $0x88] ss:$16 sps:$4 sm:$0xff]  }
 0x994   : > { %v1844_v48 = vpop.xlane.xlu0 %1843 }
 0x995   : > { %3771 = vrcp.f32 %v1844_v48  ;;  %v3684_v48 = vld [vmem:[%s4310_s5 + $0x8c] ss:$16 sps:$4 sm:$0xff]  }
 0x998   : > { %v3770_v29 = vpop.eup %3769  ;;  %v1852_v30 = vpop.permute.xlu0 %1851 }
 0x999   : > { %v1857_v31 = vsel %vm1156_vm5, %v1852_v30, 0  ;;  %v1847_v32 = vmul.f32 %v3770_v29, %v3766_v18  ;;  %v3667_v18 = vld [vmem:[%s4310_s5 + $0xc0] ss:$16 sps:$4 sm:$0xff]   ;;  %v3687_v29 = vld [vmem:[%s4310_s5 + $0x64] ss:$16 sps:$4 sm:$0xff]  }
 0x99a   : > { %3498 = vmatpush3.bf16.msra.mxu0 %v1857_v31  ;;  %v3690_v30 = vld [vmem:[%s4310_s5 + $0x6c] ss:$16 sps:$4 sm:$0xff]   ;;  %v3685_v31 = vld [vmem:[%s4310_s5 + $0x60] ss:$16 sps:$4 sm:$0xff]  }
 0x99b   : > { %v1849_v33 = vpack.c.bf16 %v1847_v32, %v1847_v32  ;;  %3509 = vmatprep.subr.bf16.mxu0 %v4054_v3  ;;  %v3688_v32 = vld [vmem:[%s4310_s5 + $0x68] ss:$16 sps:$4 sm:$0xff]  }
 0x99c   : > { %v1719_v34 = vpop.permute.xlu0 %1718 }
 0x99d   : > { %1725 = vst.msk [vmem:[#allocation2] sm:$0xf] %vm1724_vm8, %v1719_v34  ;;  %3500 = vmatmul.mubr.msk.bf16.vlgmr.msra.gmra.mxu0 %vm1128_vm4, %v1849_v33  ;;  %v3693_v33 = vld [vmem:[%s4310_s5 + $0x44] ss:$16 sps:$4 sm:$0xff]   ;;  %v3696_v34 = vld [vmem:[%s4310_s5 + $0x4c] ss:$16 sps:$4 sm:$0xff]  }
 0x99e   : > { %3525 = vmatprep.mubr.msk.bf16.mxu0 %vm4055_vm0, %v4054_v3  ;;  %3510 = vmatpush3.bf16.msra.mxu0 %v3652_v39  ;;  %v3699_v39 = vld [vmem:[%s4310_s5 + $0x24] ss:$16 sps:$4 sm:$0xff]  }
 0x99f   : > { %3511 = vmatprep.subr.bf16.mxu0 %v4054_v3 }
 0x9a2   : > { %v3772_v36 = vpop.eup %3771  ;;  %3512 = vmatpush3.bf16.msra.mxu0 %v3653_v43  ;;  %v3702_v43 = vld [vmem:[%s4310_s5 + $0x2c] ss:$16 sps:$4 sm:$0xff]  }
 0x9a3   : > { %v1848_v37 = vmul.f32 %v3772_v36, %v3768_v27  ;;  %3513 = vmatprep.subr.bf16.mxu0 %v4054_v3  ;;  %v3676_v27 = vld [vmem:[%s4310_s5 + $0xa8] ss:$16 sps:$4 sm:$0xff]   ;;  %v4059_v36 = vmov 0  }
 0x9a5   : > { %v1850_v38 = vpack.c.bf16 %v1848_v37, %v1848_v37  ;;  %v3691_v37 = vld [vmem:[%s4310_s5 + $0x40] ss:$16 sps:$4 sm:$0xff]  }
 0x9a6   : > { %3514 = vmatpush3.bf16.msra.mxu0 %v3654_v41  ;;  %v3697_v41 = vld [vmem:[%s4310_s5 + $0x20] ss:$16 sps:$4 sm:$0xff]  }
 0x9a7   : > { %3506 = vmatmul.mubr.msk.bf16.vlgmr.msra.gmra.mxu1 %vm1128_vm4, %v1850_v38  ;;  %3515 = vmatprep.subr.bf16.mxu0 %v4054_v3  ;;  %v3694_v38 = vld [vmem:[%s4310_s5 + $0x48] ss:$16 sps:$4 sm:$0xff]  }
 0x9a8   : > { %2338 = vmatpush1.bf16.msra.mxu1 %v3661_v16  ;;  %2369 = vmatprep.mubr.bf16.mxu1 %v4059_v36 }
 0x9a9   : > { %2339 = vmatprep.subr.bf16.mxu1 %v3669_v17 }
 0x9aa   : > { %3516 = vmatpush3.bf16.msra.mxu0 %v3655_v42  ;;  %v3700_v42 = vld [vmem:[%s4310_s5 + $0x28] ss:$16 sps:$4 sm:$0xff]  }
 0x9ab   : > { %3517 = vmatprep.subr.bf16.mxu0 %v4054_v3 }
 0x9ac   : > { %2340 = vmatpush1.bf16.msra.mxu1 %v3667_v18 }
 0x9ad   : > { %2341 = vmatprep.subr.bf16.mxu1 %v3675_v19  ;;  %v3711_v19 = vld [vmem:[%s4312_s1 + $0x38] sm:$0xff]  }
 0x9ae   : > { %3518 = vmatpush3.bf16.msra.mxu0 %v3656_v45  ;;  %v3705_v45 = vld [vmem:[%s4310_s5 + $0x4] ss:$16 sps:$4 sm:$0xff]  }
 0x9af   : > { %3519 = vmatprep.subr.bf16.mxu0 %v4054_v3 }
 0x9b0   : > { %2342 = vmatpush1.bf16.msra.mxu1 %v3673_v21  ;;  %v3713_v21 = vld [vmem:[%s4312_s1 + $0x70] sm:$0xff]  }
 0x9b1   : > { %2343 = vmatprep.subr.bf16.mxu1 %v3681_v35  ;;  %v3716_v35 = vld [vmem:[%s4312_s1 + $0xb0] sm:$0xff]  }
 0x9b2   : > { %3520 = vmatpush3.bf16.msra.mxu0 %v3657_v46  ;;  %v3708_v46 = vld [vmem:[%s4310_s5 + $0xc] ss:$16 sps:$4 sm:$0xff]  }
 0x9b3   : > { %3521 = vmatprep.subr.bf16.mxu0 %v4054_v3 }
 0x9b4   : > { %2344 = vmatpush1.bf16.msra.mxu1 %v3679_v28  ;;  %v3715_v28 = vld [vmem:[%s4312_s1 + $0x30] sm:$0xff]  }
 0x9b5   : > { %2345 = vmatprep.subr.bf16.mxu1 %v3687_v29  ;;  %v3719_v29 = vld [vmem:[%s4312_s1 + $0x28] sm:$0xff]  }
 0x9b6   : > { %3522 = vmatpush3.bf16.msra.mxu0 %v3658_v49  ;;  %v3706_v49 = vld [vmem:[%s4310_s5 + $0x8] ss:$16 sps:$4 sm:$0xff]  }
 0x9b7   : > { %3523 = vmatprep.subr.bf16.mxu0 %v4054_v3  ;;  %v1983_v3 = vrot.slane %v4390_v26, %v1982_v1 }
 0x9b8   : > { %2346 = vmatpush1.bf16.msra.mxu1 %v3685_v31  ;;  %v3721_v31 = vld [vmem:[%s4312_s1 + $0x60] sm:$0xff]  }
 0x9b9   : > { %2347 = vmatprep.subr.bf16.mxu1 %v3693_v33  ;;  %v3723_v33 = vld [vmem:[%s4312_s1 + $0x20] sm:$0xff]  }
 0x9ba   : > { %3524 = vmatpush3.bf16.msra.mxu0 %v3659_v52 }
 0x9bb   : > { %2380 = vmatprep.subr.bf16.mxu0 %v3666_v15 }
 0x9bc   : > { %2348 = vmatpush1.bf16.msra.mxu1 %v3691_v37  ;;  %v3726_v37 = vld [vmem:[%s4312_s1 + $0xd8] sm:$0xff]  }
 0x9bd   : > { %2349 = vmatprep.subr.bf16.mxu1 %v3699_v39  ;;  %v3728_v39 = vld [vmem:[%s4312_s1 + $0x98] sm:$0xff]  }
 0x9c0   : > { %2350 = vmatpush1.bf16.msra.mxu1 %v3697_v41  ;;  %v3730_v41 = vld [vmem:[%s4312_s1 + $0xd0] sm:$0xff]  }
 0x9c1   : > { %2351 = vmatprep.subr.bf16.mxu1 %v3705_v45  ;;  %v3732_v45 = vld [vmem:[%s4312_s1 + $0x90] sm:$0xff]  }
 0xa5d   : > { %v1893_v47 = vpop.f32.mrf.mxu0 }
 0xa5e   : > { %v3239_v50 = vpack.c.bf16 %v1893_v47, %v1893_v47  ;;  %v3703_v47 = vld [vmem:[%s4310_s5] ss:$16 sps:$4 sm:$0xff]   ;;  %s4060_s5 = smov [#allocation14]  }
 0xa5f   : > { %v3501_v51 = vpop.f32.mrf.mxu0  ;;  %2352 = vmatpush1.bf16.msra.mxu1 %v3703_v47  ;;  %v3734_v47 = vld [vmem:[%s4312_s1 + $0xc8] sm:$0xff]  }
 0xa60   : > { %1953 = vrot.lane.b32.xlu0 %v3239_v50, %s4056_s29  ;;  %v3709_v50 = vld [vmem:[%s4312_s1 + $0x78] sm:$0xff]  }
 0xa61   : > { %v1896_v53 = vpop.f32.mrf.mxu0  ;;  %v3710_v51 = vld [vmem:[%s4312_s1 + $0xf8] sm:$0xff]   ;;  %3309 = vmatprep.subr.bf16.mxu1 %v3709_v50  ;;  %v3736_v50 = vld [vmem:[%s4312_s1 + $0x88] sm:$0xff]  }
 0xa63   : > { %v3502_v54 = vpop.f32.mrf.mxu0 }
 0xa67   : > { %v1941_v55 = vpop.f32.mrf.mxu1 }
 0xa68   : > { %v3240_v56 = vpack.c.bf16 %v1941_v55, %v1941_v55 }
 0xa69   : > { %v3507_v57 = vpop.f32.mrf.mxu1 }
 0xa6a   : > { %1955 = vrot.lane.b32.xlu1 %v3240_v56, %s4056_s29 }
 0xa6b   : > { %v1944_v59 = vpop.f32.mrf.mxu1 }
 0xa6d   : > { %v3508_v61 = vpop.f32.mrf.mxu1 }
 0xad2   : > { %v1954_v62 = vpop.permute.xlu0 %1953 }
 0xad3   : > { %1960 = vst.msk [vmem:[#allocation2] sm:$0xf] %vm1959_vm9, %v1954_v62 }
 0xadc   : > { %v1956_v63 = vpop.permute.xlu1 %1955 }
 0xadd   : > { %1961 = vst.msk [vmem:[#allocation2 + $0x4] sm:$0xf] %vm1959_vm9, %v1956_v63 }
 0xae4   : > { %v3660_v0 = vld [vmem:[#allocation2] sm:$0xff]  }
 0xae5   : > { %3526 = vmatmul.mubr.bf16.vlgmr.msra.gmra.mxu0 %v3660_v0 }
 0xae6   : > { %2381 = vmatpush1.bf16.msra.mxu0 %v3664_v40  ;;  %2412 = vmatprep.mubr.bf16.mxu0 %v4059_v36  ;;  %v3725_v36 = vld [vmem:[%s4312_s1 + $0x58] sm:$0xff]  }
 0xae7   : > { %2382 = vmatprep.subr.bf16.mxu0 %v3672_v58 }
 0xaea   : > { %2383 = vmatpush1.bf16.msra.mxu0 %v3670_v5 }
 0xaeb   : > { %2384 = vmatprep.subr.bf16.mxu0 %v3678_v20  ;;  %v3712_v20 = vld [vmem:[%s4312_s1 + $0xb8] sm:$0xff]  }
 0xaee   : > { %2385 = vmatpush1.bf16.msra.mxu0 %v3676_v27  ;;  %v3714_v27 = vld [vmem:[%s4312_s1 + $0xf0] sm:$0xff]  }
 0xaef   : > { %2386 = vmatprep.subr.bf16.mxu0 %v3684_v48  ;;  %v3718_v48 = vld [vmem:[%s4312_s1 + $0xe8] sm:$0xff]  }
 0xaf2   : > { %2387 = vmatpush1.bf16.msra.mxu0 %v3682_v44  ;;  %v3717_v44 = vld [vmem:[%s4312_s1 + $0x68] sm:$0xff]  }
 0xaf3   : > { %2388 = vmatprep.subr.bf16.mxu0 %v3690_v30  ;;  %v3720_v30 = vld [vmem:[%s4312_s1 + $0xa8] sm:$0xff]  }
 0xaf6   : > { %2389 = vmatpush1.bf16.msra.mxu0 %v3688_v32  ;;  %v3722_v32 = vld [vmem:[%s4312_s1 + $0xe0] sm:$0xff]  }
 0xaf7   : > { %2390 = vmatprep.subr.bf16.mxu0 %v3696_v34  ;;  %v3724_v34 = vld [vmem:[%s4312_s1 + $0xa0] sm:$0xff]  }
 0xafa   : > { %2391 = vmatpush1.bf16.msra.mxu0 %v3694_v38  ;;  %v3727_v38 = vld [vmem:[%s4312_s1 + $0x18] sm:$0xff]  }
 0xafb   : > { %2392 = vmatprep.subr.bf16.mxu0 %v3702_v43  ;;  %v3729_v43 = vld [vmem:[%s4312_s1 + $0x50] sm:$0xff]  }
 0xafe   : > { %2393 = vmatpush1.bf16.msra.mxu0 %v3700_v42  ;;  %v3731_v42 = vld [vmem:[%s4312_s1 + $0x10] sm:$0xff]  }
 0xaff   : > { %2394 = vmatprep.subr.bf16.mxu0 %v3708_v46  ;;  %v3733_v46 = vld [vmem:[%s4312_s1 + $0x48] sm:$0xff]  }
 0xb02   : > { %2395 = vmatpush1.bf16.msra.mxu0 %v3706_v49  ;;  %v3735_v49 = vld [vmem:[%s4312_s1 + $0x8] sm:$0xff]  }
 0xb03   : > { %3331 = vmatprep.subr.bf16.mxu0 %v3710_v51  ;;  %v3737_v51 = vld [vmem:[%s4312_s1 + $0x40] sm:$0xff]  }
 0xba5   : > { %v2072_v2 = vpop.f32.mrf.mxu0 }
 0xba6   : > { %v2073_v6 = vadd.f32 %v2072_v2, %v1983_v3 }
 0xba7   : > { %v3527_v7 = vpop.f32.mrf.mxu0 }
 0xba8   : > { %v4624_v9 = vadd.f32 %v3781_v8, %v2073_v6 }
 0xba9   : > { %v2075_v10 = vpop.f32.mrf.mxu0 }
 0xbaa   : > { %v2076_v60 = vadd.f32 %v2075_v10, %v1983_v3  ;;  %2081 = vadd.xlane.f32.xlu0 %v4624_v9  ;;  %v2088_v26 = vmul.f32 %v4624_v9, %v4624_v9  ;;  %v2112_v10 = vsub.s32 4, %v4383_v23 }
 0xbab   : > { %v3528_v11 = vpop.f32.mrf.mxu0 }
 0xbac   : > { %v4627_v12 = vadd.f32 %v3782_v4, %v2076_v60 }
 0xbae   : > { %2090 = vadd.xlane.f32.xlu0 %v2088_v26  ;;  %2083 = vadd.xlane.f32.xlu1 %v4627_v12  ;;  %v2089_v13 = vmul.f32 %v4627_v12, %v4627_v12  ;;  %v4671_v26 = vld [vmem:[%s4323_s6] sm:$0xff] }
 0xbaf   : > { %v2119_v58 = vrot.slane %v4671_v26, %v2118_v14 }
 0xbb2   : > { %2092 = vadd.xlane.f32.xlu0 %v2089_v13  ;;  %v2113_v13 = vrot.slane %v4671_v26, %v2112_v10 }
 0xc33   : > { %v2082_v52 = vpop.xlane.xlu0 %2081 }
 0xc34   : > { %v2086_v53 = vmul.f32 0.0078125, %v2082_v52  ;;  %v3738_v52 = vld [vmem:[%s4312_s1 + $0xc0] sm:$0xff]  }
 0xc36   : > { %v2096_v56 = vmul.f32 %v2086_v53, %v2086_v53  ;;  %v2102_v60 = vsub.f32 %v4624_v9, %v2086_v53  ;;  %v3739_v53 = vld [vmem:[%s4312_s1] sm:$0xff]  }
 0xc37   : > { %v2091_v54 = vpop.xlane.xlu0 %2090  ;;  %v2084_v55 = vpop.xlane.xlu1 %2083 }
 0xc38   : > { %v2094_v57 = vmul.f32 0.0078125, %v2091_v54  ;;  %v2087_v59 = vmul.f32 0.0078125, %v2084_v55  ;;  %v3740_v54 = vld [vmem:[%s4312_s1 + $0x80] sm:$0xff]   ;;  %v2155_v55 = vld [vmem:[%s4328_s25] sm:$0xf]  ;;  %s2830_s1 = sshll.u32 %s4060_s5, 4  ;;  %s2831_s1 = int_to_ptr.vmem [resolvable:$true] %s2830_s1 }
 0xc39   : > { %s3952_s12 = scalar_lea.vmem %s2831_s1, 256  ;;  %p3959_p3 = scmp.lt.s32.totalorder %s2831_s1, %s2831_s1 }
 0xc3a   : > { %v2098_v61 = vsub.f32 %v2094_v57, %v2096_v56  ;;  %v2097_v0 = vmul.f32 %v2087_v59, %v2087_v59  ;;  %v2103_v15 = vsub.f32 %v4627_v12, %v2087_v59  ;;  %v2164_v59 = vrot.slane %v2155_v55, %v800_v25  ;;  %p3953_p6 = scmp.ne.s32.totalorder %s2831_s1, %s3952_s12  ;;  %p3960_p4 = scmp.lt.s32.totalorder %s3952_s12, %s3952_s12 }
 0xc3b   : > { %v2093_v62 = vpop.xlane.xlu0 %2092 }
 0xc3c   : > { %v2100_v63 = vmax.f32 %v2098_v61, 0.0  ;;  %v2095_v3 = vmul.f32 0.0078125, %v2093_v62  ;;  %v2172_v61 = vrot.slane %v2155_v55, %v1982_v1  ;;  %v2160_v62 = vrot.slane %v2155_v55, %v4386_v24  ;;  %p3954_p1 = pnand %p3953_p6, %p3565_p7  ;;  %p3961_p5 = por %p3960_p4, %p3959_p3 }
 0xc3e   : > { %v2104_v2 = vadd.f32 1e-05, %v2100_v63  ;;  %v2099_v6 = vsub.f32 %v2095_v3, %v2097_v0  ;;  %v2168_v63 = vrot.slane %v2155_v55, %v910_v22  ;;  %p3955_p2 = pneg %p3954_p1 }
 0xc40   : > { %3773 = vrsqrt.f32 %v2104_v2  ;;  %v2101_v7 = vmax.f32 %v2099_v6, 0.0  ;;  %p3962_p8 = pnand %p3961_p5, %p3955_p2 }
 0xc42   : > { %v2105_v8 = vadd.f32 1e-05, %v2101_v7 }
 0xc44   : > { %3775 = vrsqrt.f32 %v2105_v8 }
 0xc4d   : > { %v3774_v11 = vpop.eup %3773 }
 0xc4e   : > { %v2108_v4 = vmul.f32 %v3774_v11, %v2102_v60 }
 0xc50   : > { %v2114_v17 = vmul.f32 %v2113_v13, %v2108_v4 }
 0xc51   : > { %v3776_v16 = vpop.eup %3775 }
 0xc52   : > { %v2109_v40 = vmul.f32 %v3776_v16, %v2103_v15  ;;  %v4677_v18 = vadd.f32 %v2119_v58, %v2114_v17 }
 0xc54   : > { %v2115_v9 = vmul.f32 %v2113_v13, %v2109_v40 }
 0xc56   : > { %v4679_v5 = vadd.f32 %v2119_v58, %v2115_v9 }
 0xc58   : > { %v2122_v12 = vpack.c.bf16 %v4679_v5, %v4677_v18 }
 0xc5a   : > { %2370 = vmatmul.mubr.bf16.vlgmr.msra.gmra.mxu1 %v2122_v12  ;;  %2413 = vmatmul.mubr.bf16.vlgmr.msra.gmra.mxu0 %v2122_v12 }
 0xc5b   : > { %3310 = vmatpush3.bf16.msra.mxu1 %v3711_v19  ;;  %3332 = vmatpush3.bf16.msra.mxu0 %v3712_v20 }
 0xc5c   : > { %3311 = vmatprep.subr.bf16.mxu1 %v3713_v21  ;;  %3333 = vmatprep.subr.bf16.mxu0 %v3714_v27  ;;  %v2501_v27 = vsub.s32 6, %v4383_v23 }
 0xc5f   : > { %3312 = vmatpush3.bf16.msra.mxu1 %v3715_v28  ;;  %3334 = vmatpush3.bf16.msra.mxu0 %v3716_v35 }
 0xc60   : > { %3313 = vmatprep.subr.bf16.mxu1 %v3717_v44  ;;  %3335 = vmatprep.subr.bf16.mxu0 %v3718_v48  ;;  %v2502_v44 = vrot.slane %v4671_v26, %v2501_v27 }
 0xc63   : > { %3314 = vmatpush3.bf16.msra.mxu1 %v3719_v29  ;;  %3336 = vmatpush3.bf16.msra.mxu0 %v3720_v30 }
 0xc64   : > { %3315 = vmatprep.subr.bf16.mxu1 %v3721_v31  ;;  %3337 = vmatprep.subr.bf16.mxu0 %v3722_v32 }
 0xc67   : > { %3316 = vmatpush3.bf16.msra.mxu1 %v3723_v33  ;;  %3338 = vmatpush3.bf16.msra.mxu0 %v3724_v34 }
 0xc68   : > { %3317 = vmatprep.subr.bf16.mxu1 %v3725_v36  ;;  %3339 = vmatprep.subr.bf16.mxu0 %v3726_v37 }
 0xc6b   : > { %3318 = vmatpush3.bf16.msra.mxu1 %v3727_v38  ;;  %3340 = vmatpush3.bf16.msra.mxu0 %v3728_v39 }
 0xc6c   : > { %3319 = vmatprep.subr.bf16.mxu1 %v3729_v43  ;;  %3341 = vmatprep.subr.bf16.mxu0 %v3730_v41 }
 0xc6f   : > { %3320 = vmatpush3.bf16.msra.mxu1 %v3731_v42  ;;  %3342 = vmatpush3.bf16.msra.mxu0 %v3732_v45 }
 0xc70   : > { %3321 = vmatprep.subr.bf16.mxu1 %v3733_v46  ;;  %3343 = vmatprep.subr.bf16.mxu0 %v3734_v47 }
 0xc73   : > { %3322 = vmatpush3.bf16.msra.mxu1 %v3735_v49  ;;  %3344 = vmatpush3.bf16.msra.mxu0 %v3736_v50 }
 0xc74   : > { %3323 = vmatprep.subr.bf16.mxu1 %v3737_v51  ;;  %3345 = vmatprep.subr.bf16.mxu0 %v3738_v52 }
 0xc77   : > { %3324 = vmatpush3.bf16.msra.mxu1 %v3739_v53  ;;  %3346 = vmatpush3.bf16.msra.mxu0 %v3740_v54 }
 0xd1a   : > { %v2371_v56 = vpop.f32.mrf.mxu1  ;;  %v2414_v57 = vpop.f32.mrf.mxu0 }
 0xd1b   : > { %v2372_v11 = vadd.f32 %v2371_v56, %v2160_v62  ;;  %v2415_v4 = vadd.f32 %v2414_v57, %v2168_v63 }
 0xd1c   : > { %v2373_v0 = vpop.f32.mrf.mxu1  ;;  %v2416_v3 = vpop.f32.mrf.mxu0 }
 0xd1d   : > { %v2374_v7 = vadd.f32 %v2373_v0, %v2164_v59  ;;  %v2417_v8 = vadd.f32 %v2416_v3, %v2172_v61  ;;  %v2423_v58 = vmax.f32 %v2372_v11, 0.0  ;;  %v2425_v9 = vmax.f32 %v2415_v4, 0.0 }
 0xd1e   : > { %v2375_v2 = vpop.f32.mrf.mxu1  ;;  %v2418_v6 = vpop.f32.mrf.mxu0 }
 0xd1f   : > { %v2376_v10 = vadd.f32 %v2375_v2, %v2160_v62  ;;  %v2419_v60 = vadd.f32 %v2418_v6, %v2168_v63  ;;  %v2424_v24 = vmax.f32 %v2374_v7, 0.0  ;;  %v2426_v40 = vmax.f32 %v2417_v8, 0.0 }
 0xd20   : > { %v2377_v13 = vpop.f32.mrf.mxu1  ;;  %v2420_v25 = vpop.f32.mrf.mxu0  ;;  %v2809_v2 = vsub.s32 7, %v4383_v23 }
 0xd21   : > { %v2378_v14 = vadd.f32 %v2377_v13, %v2164_v59  ;;  %v2421_v15 = vadd.f32 %v2420_v25, %v2172_v61  ;;  %v2427_v1 = vmax.f32 %v2376_v10, 0.0  ;;  %v2429_v16 = vmax.f32 %v2419_v60, 0.0  ;;  %v3215_v60 = vld [vmem:[%s4323_s6 + $0x8] ss:$0 sm:$0xff] }
 0xd22   : > { %v2810_v7 = vrot.slane %v4671_v26, %v2809_v2 }
 0xd23   : > { %v2428_v17 = vmax.f32 %v2378_v14, 0.0  ;;  %v2430_v22 = vmax.f32 %v2421_v15, 0.0  ;;  %v2431_v12 = vpack.c.bf16 %v2427_v1, %v2423_v58  ;;  %v2433_v21 = vpack.c.bf16 %v2429_v16, %v2425_v9 }
 0xd25   : > { %v2432_v19 = vpack.c.bf16 %v2428_v17, %v2424_v24  ;;  %v2434_v20 = vpack.c.bf16 %v2430_v22, %v2426_v40 }
 0xd27   : > { %2727 = vmatprep.mubr.bf16.mxu1 %v2432_v19  ;;  %2768 = vmatprep.mubr.bf16.mxu0 %v2434_v20 }
 0xd28   : > { %2728 = vmatmul.mubr.bf16.vlgmr.msra.gmra.mxu1 %v2431_v12  ;;  %2769 = vmatmul.mubr.bf16.vlgmr.msra.gmra.mxu0 %v2433_v21 }
 0xde8   : > { %v3325_v28 = vpop.f32.mrf.mxu1  ;;  %v3347_v35 = vpop.f32.mrf.mxu0 }
 0xdea   : > { %v3326_v48 = vpop.f32.mrf.mxu1  ;;  %v3348_v29 = vpop.f32.mrf.mxu0 }
 0xdeb   : > { %v3327_v30 = vadd.f32 %v3326_v48, %v3325_v28  ;;  %v3349_v34 = vadd.f32 %v3348_v29, %v3347_v35 }
 0xdec   : > { %v3328_v31 = vpop.f32.mrf.mxu1  ;;  %v3350_v32 = vpop.f32.mrf.mxu0 }
 0xded   : > { %v2730_v33 = vadd.f32 %v3327_v30, %v2502_v44 }
 0xdee   : > { %v3329_v36 = vpop.f32.mrf.mxu1  ;;  %v3351_v37 = vpop.f32.mrf.mxu0 }
 0xdef   : > { %v2771_v38 = vadd.f32 %v3349_v34, %v2730_v33  ;;  %v3330_v39 = vadd.f32 %v3329_v36, %v3328_v31  ;;  %v3352_v41 = vadd.f32 %v3351_v37, %v3350_v32 }
 0xdf1   : > { %v2733_v43 = vadd.f32 %v3330_v39, %v2502_v44  ;;  %v2777_v42 = vadd.f32 %v2771_v38, %v4677_v18 }
 0xdf3   : > { %v2774_v45 = vadd.f32 %v3352_v41, %v2733_v43  ;;  %2779 = vadd.xlane.f32.xlu0 %v2777_v42  ;;  %v2785_v47 = vmul.f32 %v2777_v42, %v2777_v42 }
 0xdf5   : > { %v2778_v46 = vadd.f32 %v2774_v45, %v4679_v5 }
 0xdf7   : > { %2781 = vadd.xlane.f32.xlu1 %v2778_v46  ;;  %2787 = vadd.xlane.f32.xlu0 %v2785_v47  ;;  %v2786_v49 = vmul.f32 %v2778_v46, %v2778_v46 }
 0xdfb   : > { %2789 = vadd.xlane.f32.xlu1 %v2786_v49 }
 0xe7c   : > { %v2780_v50 = vpop.xlane.xlu0 %2779 }
 0xe7d   : > { %v2783_v51 = vmul.f32 0.0078125, %v2780_v50 }
 0xe7f   : > { %v2793_v54 = vmul.f32 %v2783_v51, %v2783_v51  ;;  %v2799_v6 = vsub.f32 %v2777_v42, %v2783_v51 }
 0xe80   : > { %v2782_v52 = vpop.xlane.xlu1 %2781  ;;  %v2788_v53 = vpop.xlane.xlu0 %2787 }
 0xe81   : > { %v2784_v55 = vmul.f32 0.0078125, %v2782_v52  ;;  %v2791_v56 = vmul.f32 0.0078125, %v2788_v53 }
 0xe83   : > { %v2795_v57 = vsub.f32 %v2791_v56, %v2793_v54  ;;  %v2794_v18 = vmul.f32 %v2784_v55, %v2784_v55  ;;  %v2800_v11 = vsub.f32 %v2778_v46, %v2784_v55 }
 0xe84   : > { %v2790_v59 = vpop.xlane.xlu1 %2789 }
 0xe85   : > { %v2797_v61 = vmax.f32 %v2795_v57, 0.0  ;;  %v2792_v62 = vmul.f32 0.0078125, %v2790_v59 }
 0xe87   : > { %v2801_v63 = vadd.f32 1e-05, %v2797_v61  ;;  %v2796_v5 = vsub.f32 %v2792_v62, %v2794_v18 }
 0xe89   : > { %3777 = vrsqrt.f32 %v2801_v63  ;;  %v2798_v0 = vmax.f32 %v2796_v5, 0.0 }
 0xe8b   : > { %v2802_v3 = vadd.f32 1e-05, %v2798_v0 }
 0xe8d   : > { %3779 = vrsqrt.f32 %v2802_v3 }
 0xe96   : > { %v3778_v8 = vpop.eup %3777 }
 0xe97   : > { %v2805_v10 = vmul.f32 %v3778_v8, %v2799_v6 }
 0xe99   : > { %v2811_v4 = vmul.f32 %v2810_v7, %v2805_v10 }
 0xe9a   : > { %v3780_v13 = vpop.eup %3779 }
 0xe9b   : > { %v2806_v25 = vmul.f32 %v3780_v13, %v2800_v11  ;;  %v2817_v14 = vadd.f32 %v3215_v60, %v2811_v4 }
 0xe9d   : > { %v2812_v15 = vmul.f32 %v2810_v7, %v2806_v25  ;;  %2819 = vst [vmem:[#allocation14] sm:$0xff] %v2817_v14 }
 0xe9f   : > { %v2818_v1 = vadd.f32 %v3215_v60, %v2812_v15 }
 0xea1   : > { %2820 = vst [vmem:[#allocation14 + $0x8] sm:$0xff] %v2818_v1 }
 0xea2   : > { %3965 = shalt.err (!%p3962_p8)
}
 0xea3   : > { %s4061_s24 = smov 128   ;;  %s4062_s10 = smov 8  }
 0xea4   : > { %s4805_s26 = sld [smem:[#allocation32_spill]] }
 0xeaa   : > { %3542 = dma.vmem_to_hbm [thread:$0]  (%p3565_p7), %s2831_s1, 256, %s4805_s26, [#allocation5], %s4061_s24, %s4061_s24, %s4062_s10  }
 0xeab   : > { %4017 = dma.done.wait (%p3565_p7), [#allocation5], 256  }
 0xeac   : > { %4019 = vsyncadd (%p3565_p7), [#allocation5], 4294967040 }
 0xead PF: > { %s4806_s0 = sld [smem:[#allocation22_spill]]  ;;  %s4810_s13 = smov %s4026_s14 }
 0xeae   : > { %s4807_s20 = sld [smem:[#allocation20_spill]]  ;;  %s4812_s16 = smov %s4038_s17 }
 0xeaf   : > { %s4808_s15 = sld [smem:[#allocation25_spill]] }
 0xeb0   : > { %s4809_s25 = sld [smem:[#allocation24_spill]] }
 0xeb3   : > { %s33_s18 = sadd.s32 1, %s4806_s0  }
 0xeb4   : > { %p30_p12 = scmp.ge.s32.totalorder %s33_s18, 4   ;;  %s4811_s14 = smov %s4807_s20 }
 0xeb6   : > { %s4813_s17 = smov %s4809_s25  ;;  %32 = sbr.rel (!%p30_p12) target bundleno = 19 (0x13), region = 175 }
 0xebb   :  { %2846 = vsyncpa [#allocation4], 1 }
 0xebc   :  { %2848 = vsyncpa [#allocation4 + $0x1], 1 }
 0xebd   :  { %2849 = vsyncpa [#allocation7], 1 }
 0xebe   :  { %2851 = vsyncpa [#allocation7 + $0x1], 1 }
 0xebf   :  { %2852 = vsyncpa [#allocation10], 1 }
 0xec0   :  { %2854 = vsyncpa [#allocation10 + $0x1], 1 }
 0xec1   :  { %2855 = vsyncpa [#allocation13], 1 }
 0xec2   :  { %2857 = vsyncpa [#allocation13 + $0x1], 1 }
 0xec3   :  { %2858 = vsyncpa [#allocation5], 1 }
 0xec4   :  { %2860 = vsyncpa [#allocation5 + $0x1], 1 }

</bundles_post_ra>
